<compile_context>
chip_gen: v6e
topology: v6e:2x2x1
jax: 0.10.0
libtpu: 0.0.40
codegen_flags: <defaults>
</compile_context>

<pallas_src>
import jax
import jax.numpy as jnp
import numpy as np
from jax.experimental import pallas as pl
from jax.experimental.pallas import tpu as pltpu

LANES = 128                 # all channel dims are zero-padded to the lane width
MXU_DTYPE = jnp.bfloat16    # MXU operand dtype (accumulation stays f32)


# ----------------------------------------------------------------------------- kernel
def mpnn_kernel(src_idx_ref, dst_idx_ref, node_hbm, w_ref, b_ref, out_ref,
                node_vmem, proj_a, proj_b, copy_sem):
    f32 = jnp.float32
    i = pl.program_id(0)            # node shard  ("parallel": 1 on v5e/v6e, 2 on v7x)
    k = pl.program_id(1)            # edge tile   ("arbitrary" reduction)
    n_pad = node_vmem.shape[0]
    t_e = src_idx_ref.shape[1]
    t_n = out_ref.shape[0]

    # ---- once per node shard: bring the node slab into VMEM (single-buffered,
    # no BlockSpec double-buffer) and pre-project it through the edge-net first
    # layer.  src@W1a + dst@W1b == gather(X@W1a, src) + gather(X@W1b, dst), so
    # the gather matmul itself performs the first layer and the per-edge-tile
    # W1 matmuls disappear.
    @pl.when(k == 0)
    def _init():
        cp = pltpu.make_async_copy(node_hbm, node_vmem, copy_sem)
        cp.start()
        cp.wait()
        x = node_vmem[...]                                            # (n_pad, 128) bf16
        proj_a[...] = jnp.dot(x, w_ref[0],
                              preferred_element_type=f32).astype(MXU_DTYPE)
        proj_b[...] = jnp.dot(x, w_ref[1],
                              preferred_element_type=f32).astype(MXU_DTYPE)
        out_ref[...] = jnp.zeros_like(out_ref)

    src_ids = src_idx_ref[...]      # (1, tE) int32, padded edges hold -1
    dst_ids = dst_idx_ref[...]      # (1, tE) int32
    biases = b_ref[...]             # (8, 128) f32

    # ---- gather-and-project this edge tile's endpoints.  Indices stay on the
    # lane axis (pure VPU compares, no relayout); one-hots are built directly
    # in bf16 (single cast) and the node-axis contraction runs on the MXU with
    # f32 accumulation (exact row selection of the bf16 projections).
    node_iota = jax.lax.broadcasted_iota(jnp.int32, (n_pad, t_e), 0)
    oh_src = (node_iota == src_ids).astype(MXU_DTYPE)                 # (n_pad, tE) bf16
    oh_dst = (node_iota == dst_ids).astype(MXU_DTYPE)
    dim0 = (((0,), (0,)), ((), ()))
    e = (jax.lax.dot_general(oh_src, proj_a[...], dim0, preferred_element_type=f32)
         + jax.lax.dot_general(oh_dst, proj_b[...], dim0, preferred_element_type=f32)
         + biases[0:1])                                               # (tE, 128) f32
    e = jnp.maximum(e, 0.0)
    msg = jnp.tanh(jnp.dot(e.astype(MXU_DTYPE), w_ref[2],
                           preferred_element_type=f32) + biases[1:2])  # (tE, 128) f32

    # ---- scatter-add messages to this shard's node rows.  bf16 operands
    # (MXU-native everywhere), f32 accumulation directly into the
    # reduction-resident output block (no separate acc scratch).
    row_iota = jax.lax.broadcasted_iota(jnp.int32, (t_n, t_e), 0) + i * t_n
    scat = (row_iota == dst_ids).astype(MXU_DTYPE)                    # (tN, tE) bf16
    out_ref[...] += jnp.dot(scat, msg.astype(MXU_DTYPE),
                            preferred_element_type=f32)

    # ---- after the last edge tile: node nets + one lane-dense 128-wide store.
    @pl.when(k == pl.num_programs(1) - 1)
    def _finalize():
        agg = out_ref[...]                                            # (tN, 128) f32
        h1 = jnp.maximum(jnp.dot(agg.astype(MXU_DTYPE), w_ref[3],
                                 preferred_element_type=f32) + biases[2:3], 0.0)
        n1 = jnp.tanh(jnp.dot(h1.astype(MXU_DTYPE), w_ref[4],
                              preferred_element_type=f32) + biases[3:4])

        # Hint only guarantees a multiple of t_n (not 128); t_n is a multiple
        # of 16, so the bf16 sublane slice stays tile-aligned.
        row0 = pl.multiple_of(i * t_n, t_n)
        h_own = node_vmem[pl.ds(row0, t_n), :]                        # (tN, 128) bf16
        h2 = jnp.maximum(jnp.dot(h_own, w_ref[5],
                                 preferred_element_type=f32) + biases[4:5], 0.0)
        n2 = jnp.tanh(jnp.dot(h2.astype(MXU_DTYPE), w_ref[6],
                              preferred_element_type=f32) + biases[5:6])

        # n1 occupies lanes [0, half); n2 occupies lanes [half, F_out); rest = 0.
        out_ref[...] = n1 + n2


# ----------------------------------------------------------------------------- packing
def _embed(w, rows, cols, r0=0, c0=0):
    """Zero-pad w into a (rows, cols) slab at offset (r0, c0)."""
    return jnp.zeros((rows, cols), jnp.float32).at[r0:r0 + w.shape[0],
                                                   c0:c0 + w.shape[1]].set(w)


def _pack_params(params):
    f_out = params["w2"].shape[0]
    half = f_out // 2
    lp = LANES
    w_stack = jnp.stack([
        _embed(params["w1a"], lp, lp),
        _embed(params["w1b"], lp, lp),
        _embed(params["w2"], lp, lp),
        _embed(params["w3"], lp, lp),
        _embed(params["w4"], lp, lp, 0, 0),        # n1 -> lanes [0, half)
        _embed(params["w5"], lp, lp),
        _embed(params["w6"], lp, lp, 0, half),     # n2 -> lanes [half, 2*half)
    ]).astype(MXU_DTYPE)                           # (7, 128, 128) bf16

    b_stack = jnp.zeros((8, lp), jnp.float32)
    b_stack = b_stack.at[0, :f_out].set(params["b1"][0])
    b_stack = b_stack.at[1, :f_out].set(params["b2"][0])
    b_stack = b_stack.at[2, :f_out].set(params["b3"][0])
    b_stack = b_stack.at[3, :half].set(params["b4"][0])
    b_stack = b_stack.at[4, :f_out].set(params["b5"][0])
    b_stack = b_stack.at[5, half:2 * half].set(params["b6"][0])
    return w_stack, b_stack


# ----------------------------------------------------------------------------- sizing
def _vmem_plan(vmem_budget_bytes=None):
    """Per-generation (live-data budget, scoped vmem_limit_bytes)."""
    try:
        cap = int(pltpu.get_tpu_info().vmem_capacity_bytes)
    except Exception:
        cap = 64 << 20          # no info -> assume the smallest part (v7x, 64 MiB)
    budget = int(cap * 0.40) if vmem_budget_bytes is None else int(vmem_budget_bytes)
    limit = min(int(cap * 0.85), max(32 << 20, 2 * budget))
    return budget, limit


def _choose_edge_tile(n_edges, n_pad, tile_n, budget_bytes):
    """Largest edge tile whose live VMEM fits the budget (real dtypes)."""
    resident = (3 * n_pad * LANES * 2              # node slab + 2 projections (bf16, single)
                + 2 * (7 * LANES * LANES * 2)      # packed weights, double-buffered
                + 2 * (8 * LANES * 4)              # packed biases, double-buffered
                + 2 * tile_n * LANES * 4)          # out block (+ pipeline copy)
    per_edge = (2 * n_pad * 2                      # two gather one-hots (bf16)
                + tile_n * 2                       # scatter one-hot (bf16)
                + 8 * LANES * 4                    # ~8 f32 activation rows of width 128
                + 2 * 4 * 2)                       # double-buffered src/dst index columns
    avail = max(budget_bytes - resident, 1 << 20)
    t = max(256, (avail // per_edge) // 128 * 128)
    t = min(t, pl.cdiv(n_edges, 128) * 128)
    return int(max(t, 128))


# ----------------------------------------------------------------------------- wrapper
def mpnn_forward_pallas(node_feat, src_idx, dst_idx, params, *,
                        node_shards=1, tile_e=None, vmem_budget_bytes=None):
    """Message-passing forward on a graph given as (src_idx, dst_idx) edge lists.

    node_shards=1 on single-TensorCore parts (v5e/v6e); node_shards=2 on v7x to
    split the dominant edge work across both TensorCores (costs 2x edge-MLP
    redundancy, per review trade-off)."""
    N, f_in = node_feat.shape
    E = int(src_idx.shape[0])
    f_out = params["w2"].shape[0]
    lp = LANES

    budget, vmem_limit = _vmem_plan(vmem_budget_bytes)

    # Pad node rows so every shard is a whole number of bf16 sublane tiles (16).
    row_mult = 16 * node_shards
    n_pad = pl.cdiv(N, row_mult) * row_mult
    tile_n = n_pad // node_shards

    if tile_e is None:
        tile_e = _choose_edge_tile(E, n_pad, tile_n, budget)
    e_pad = pl.cdiv(E, tile_e) * tile_e

    # Node features zero-padded to (n_pad, 128) bf16; padded edges get index -1
    # so they gather zeros and scatter nowhere.
    node_pad = jnp.zeros((n_pad, lp), jnp.float32).at[:N, :f_in].set(node_feat)
    node_pad = node_pad.astype(MXU_DTYPE)
    src2d = jnp.full((1, e_pad), -1, jnp.int32).at[0, :E].set(src_idx.astype(jnp.int32))
    dst2d = jnp.full((1, e_pad), -1, jnp.int32).at[0, :E].set(dst_idx.astype(jnp.int32))

    w_stack, b_stack = _pack_params(params)

    grid = (node_shards, e_pad // tile_e)

    out_pad = pl.pallas_call(
        mpnn_kernel,
        out_shape=jax.ShapeDtypeStruct((n_pad, lp), jnp.float32),
        grid_spec=pltpu.PrefetchScalarGridSpec(
            num_scalar_prefetch=0,
            grid=grid,
            in_specs=[
                pl.BlockSpec((1, tile_e), lambda i, k: (0, k)),       # src ids (streamed)
                pl.BlockSpec((1, tile_e), lambda i, k: (0, k)),       # dst ids (streamed)
                pl.BlockSpec(memory_space=pl.ANY),                    # node slab (HBM)
                pl.BlockSpec((7, lp, lp), lambda i, k: (0, 0, 0)),    # packed weights (bf16)
                pl.BlockSpec((8, lp), lambda i, k: (0, 0)),           # packed biases (f32)
            ],
            out_specs=pl.BlockSpec((tile_n, lp), lambda i, k: (i, 0)),
            scratch_shapes=[
                pltpu.VMEM((n_pad, lp), MXU_DTYPE),   # node slab (single-buffered)
                pltpu.VMEM((n_pad, lp), MXU_DTYPE),   # X @ W1a (pre-projected)
                pltpu.VMEM((n_pad, lp), MXU_DTYPE),   # X @ W1b (pre-projected)
                pltpu.SemaphoreType.DMA(()),          # node-slab copy semaphore
            ],
        ),
        compiler_params=pltpu.CompilerParams(
            dimension_semantics=("parallel", "arbitrary"),
            vmem_limit_bytes=vmem_limit,
        ),
    )(src2d, dst2d, node_pad, w_stack, b_stack)

    return out_pad[:N, :f_out]


# ----------------------------------------------------------------------------- params / reference
def init_params(key, in_features, out_features):
    """Deterministic synthetic weights. Linear stored as (fan_in, fan_out) = W^T."""
    ks = jax.random.split(key, 12)
    s = 0.1
    half = out_features // 2
    return {
        "w1a": jax.random.normal(ks[0], (in_features, out_features), jnp.float32) * s,
        "w1b": jax.random.normal(ks[1], (in_features, out_features), jnp.float32) * s,
        "b1":  jax.random.normal(ks[2], (1, out_features), jnp.float32) * s,
        "w2":  jax.random.normal(ks[3], (out_features, out_features), jnp.float32) * s,
        "b2":  jax.random.normal(ks[4], (1, out_features), jnp.float32) * s,
        "w3":  jax.random.normal(ks[5], (out_features, out_features), jnp.float32) * s,
        "b3":  jax.random.normal(ks[6], (1, out_features), jnp.float32) * s,
        "w4":  jax.random.normal(ks[7], (out_features, half), jnp.float32) * s,
        "b4":  jax.random.normal(ks[8], (1, half), jnp.float32) * s,
        "w5":  jax.random.normal(ks[9], (in_features, out_features), jnp.float32) * s,
        "b5":  jax.random.normal(ks[10], (1, out_features), jnp.float32) * s,
        "w6":  jax.random.normal(ks[11], (out_features, half), jnp.float32) * s,
        "b6":  jnp.zeros((1, half), jnp.float32),
    }


def mpnn_forward_ref(node_feat, src_idx, dst_idx, params):
    """Pure-JAX f32 reference mirroring the PyTorch module."""
    src = node_feat[src_idx]
    dst = node_feat[dst_idx]
    cat = jnp.concatenate([src, dst], axis=1)
    w1 = jnp.concatenate([params["w1a"], params["w1b"]], axis=0)
    e = jnp.maximum(cat @ w1 + params["b1"], 0.0)
    msg = jnp.tanh(e @ params["w2"] + params["b2"])
    agg = jnp.zeros((node_feat.shape[0], msg.shape[1]), jnp.float32).at[dst_idx].add(msg)
    h1 = jnp.maximum(agg @ params["w3"] + params["b3"], 0.0)
    n1 = jnp.tanh(h1 @ params["w4"] + params["b4"])
    h2 = jnp.maximum(node_feat @ params["w5"] + params["b5"], 0.0)
    n2 = jnp.tanh(h2 @ params["w6"] + params["b6"])
    return jnp.concatenate([n1, n2], axis=1)


# ----------------------------------------------------------------------------- demo
if __name__ == "__main__":
    in_features = 32
    out_features = 32
    N = 100        # nodes -> padded to 128 rows = 2 shards of 64
    E = 500        # edges -> padded to 512 = 2 edge tiles of 256 (exercises the reduction)

    key = jax.random.PRNGKey(0)
    k_feat, k_src, k_dst, k_par = jax.random.split(key, 4)

    node_feat = jax.random.normal(k_feat, (N, in_features), jnp.float32)
    src_idx = jax.random.randint(k_src, (E,), 0, N, dtype=jnp.int32)
    dst_idx = jax.random.randint(k_dst, (E,), 0, N, dtype=jnp.int32)
    params = init_params(k_par, in_features, out_features)

    # node_shards=2 exercises the "parallel" node axis (the v7x two-core split);
    # use node_shards=1 in production on v5e/v6e (no edge redundancy).
    out = mpnn_forward_pallas(node_feat, src_idx, dst_idx, params,
                              node_shards=2, tile_e=256)
    out = jax.block_until_ready(out)

    ref = jax.block_until_ready(mpnn_forward_ref(node_feat, src_idx, dst_idx, params))
    # bf16 MXU operands + bf16 projection / message rounding (f32 accumulation)
    # -> small mixed-precision deviation vs the f32 reference.
    np.testing.assert_allclose(np.asarray(out), np.asarray(ref), rtol=5e-2, atol=5e-2)

    print("KERNEL_OK")
</pallas_src>

<mosaic_0001>
module attributes {stable_mosaic.version = 11 : i64} {
  func.func @mpnn_kernel(%arg0: i32, %arg1: i32, %arg2: memref<1x256xi32, #tpu.memory_space<vmem>>, %arg3: memref<1x256xi32, #tpu.memory_space<vmem>>, %arg4: memref<128x128xbf16, #tpu.memory_space<any>>, %arg5: memref<7x128x128xbf16, #tpu.memory_space<vmem>>, %arg6: memref<8x128xf32, #tpu.memory_space<vmem>>, %arg7: memref<64x128xf32, #tpu.memory_space<vmem>>, %arg8: memref<128x128xbf16, #tpu.memory_space<vmem>>, %arg9: memref<128x128xbf16, #tpu.memory_space<vmem>>, %arg10: memref<128x128xbf16, #tpu.memory_space<vmem>>, %arg11: memref<!tpu.dma_semaphore, #tpu.memory_space<semaphore_mem>>) attributes {dimension_semantics = [#tpu.dimension_semantics<parallel>, #tpu.dimension_semantics<arbitrary>], iteration_bounds = array<i64: 2, 2>, scalar_prefetch = 0 : i64, scratch_operands = 4 : i64, tpu.core_type = #tpu.core_type<tc>, window_params = [{transform_indices = @transform_0, window_bounds = array<i64: 1, 256>}, {transform_indices = @transform_1, window_bounds = array<i64: 1, 256>}, {}, {pipeline_mode = #tpu.pipeline_mode<synchronous>, transform_indices = @transform_3, window_bounds = array<i64: 7, 128, 128>}, {pipeline_mode = #tpu.pipeline_mode<synchronous>, transform_indices = @transform_4, window_bounds = array<i64: 8, 128>}, {transform_indices = @transform_5, window_bounds = array<i64: 64, 128>}]} {
    %c0_i32 = arith.constant 0 : i32
    %0 = arith.cmpi eq, %arg1, %c0_i32 : i32
    %1 = arith.extui %0 : i1 to i32
    %c0_i32_0 = arith.constant 0 : i32
    %2 = arith.cmpi ne, %1, %c0_i32_0 : i32
    scf.if %2 {
      tpu.enqueue_dma source(%arg4 : memref<128x128xbf16, #tpu.memory_space<any>>) target(%arg8 : memref<128x128xbf16, #tpu.memory_space<vmem>>) target_semaphore(%arg11 : memref<!tpu.dma_semaphore, #tpu.memory_space<semaphore_mem>>)
      tpu.wait_dma2 semaphore(%arg11 : memref<!tpu.dma_semaphore, #tpu.memory_space<semaphore_mem>>) src(%arg4 : memref<128x128xbf16, #tpu.memory_space<any>>) dst(%arg8 : memref<128x128xbf16, #tpu.memory_space<vmem>>)
      %c0_21 = arith.constant 0 : index
      %c0_22 = arith.constant 0 : index
      %52 = vector.load %arg8[%c0_21, %c0_22] : memref<128x128xbf16, #tpu.memory_space<vmem>>, vector<128x128xbf16>
      %c0_23 = arith.constant 0 : index
      %c0_24 = arith.constant 0 : index
      %c0_25 = arith.constant 0 : index
      %53 = vector.load %arg5[%c0_23, %c0_24, %c0_25] : memref<7x128x128xbf16, #tpu.memory_space<vmem>>, vector<1x128x128xbf16>
      %54 = vector.shape_cast %53 : vector<1x128x128xbf16> to vector<128x128xbf16>
      %cst_26 = arith.constant dense<0.000000e+00> : vector<128x128xf32>
      %55 = tpu.matmul %52, %54, %cst_26 {dimension_numbers = #tpu.dot_dimension_numbers<[1], [0], [0], [1], [0, 0, 1, 1], [], []>} : vector<128x128xbf16>, vector<128x128xbf16>, vector<128x128xf32> -> vector<128x128xf32>
      %56 = arith.truncf %55 : vector<128x128xf32> to vector<128x128xbf16>
      %c0_27 = arith.constant 0 : index
      %c0_28 = arith.constant 0 : index
      %57 = vector.load %arg9[%c0_27, %c0_28] : memref<128x128xbf16, #tpu.memory_space<vmem>>, vector<128x128xbf16>
      tpu.vector_store %arg9[%c0_27, %c0_28], %56 {strides = array<i32>} : memref<128x128xbf16, #tpu.memory_space<vmem>>, vector<128x128xbf16>,
      %c1 = arith.constant 1 : index
      %c0_29 = arith.constant 0 : index
      %c0_30 = arith.constant 0 : index
      %58 = vector.load %arg5[%c1, %c0_29, %c0_30] : memref<7x128x128xbf16, #tpu.memory_space<vmem>>, vector<1x128x128xbf16>
      %59 = vector.shape_cast %58 : vector<1x128x128xbf16> to vector<128x128xbf16>
      %cst_31 = arith.constant dense<0.000000e+00> : vector<128x128xf32>
      %60 = tpu.matmul %52, %59, %cst_31 {dimension_numbers = #tpu.dot_dimension_numbers<[1], [0], [0], [1], [0, 0, 1, 1], [], []>} : vector<128x128xbf16>, vector<128x128xbf16>, vector<128x128xf32> -> vector<128x128xf32>
      %61 = arith.truncf %60 : vector<128x128xf32> to vector<128x128xbf16>
      %c0_32 = arith.constant 0 : index
      %c0_33 = arith.constant 0 : index
      %62 = vector.load %arg10[%c0_32, %c0_33] : memref<128x128xbf16, #tpu.memory_space<vmem>>, vector<128x128xbf16>
      tpu.vector_store %arg10[%c0_32, %c0_33], %61 {strides = array<i32>} : memref<128x128xbf16, #tpu.memory_space<vmem>>, vector<128x128xbf16>,
      %cst_34 = arith.constant 0.000000e+00 : f32
      %63 = vector.broadcast %cst_34 : f32 to vector<64x128xf32>
      %c0_35 = arith.constant 0 : index
      %c0_36 = arith.constant 0 : index
      %64 = vector.load %arg7[%c0_35, %c0_36] : memref<64x128xf32, #tpu.memory_space<vmem>>, vector<64x128xf32>
      tpu.vector_store %arg7[%c0_35, %c0_36], %63 {strides = array<i32>} : memref<64x128xf32, #tpu.memory_space<vmem>>, vector<64x128xf32>,
    } else {
    }
    %c0 = arith.constant 0 : index
    %c0_1 = arith.constant 0 : index
    %3 = vector.load %arg2[%c0, %c0_1] : memref<1x256xi32, #tpu.memory_space<vmem>>, vector<1x256xi32>
    %c0_2 = arith.constant 0 : index
    %c0_3 = arith.constant 0 : index
    %4 = vector.load %arg3[%c0_2, %c0_3] : memref<1x256xi32, #tpu.memory_space<vmem>>, vector<1x256xi32>
    %c0_4 = arith.constant 0 : index
    %c0_5 = arith.constant 0 : index
    %5 = vector.load %arg6[%c0_4, %c0_5] : memref<8x128xf32, #tpu.memory_space<vmem>>, vector<8x128xf32>
    %6 = tpu.iota {dimensions = array<i32: 0>} : vector<128x256xi32>
    %7 = vector.broadcast %3 : vector<1x256xi32> to vector<128x256xi32>
    %8 = arith.cmpi eq, %6, %7 : vector<128x256xi32>
    %9 = arith.extui %8 : vector<128x256xi1> to vector<128x256xi32>
    %10 = arith.sitofp %9 : vector<128x256xi32> to vector<128x256xf32>
    %11 = arith.truncf %10 : vector<128x256xf32> to vector<128x256xbf16>
    %12 = vector.broadcast %4 : vector<1x256xi32> to vector<128x256xi32>
    %13 = arith.cmpi eq, %6, %12 : vector<128x256xi32>
    %14 = arith.extui %13 : vector<128x256xi1> to vector<128x256xi32>
    %15 = arith.sitofp %14 : vector<128x256xi32> to vector<128x256xf32>
    %16 = arith.truncf %15 : vector<128x256xf32> to vector<128x256xbf16>
    %c0_6 = arith.constant 0 : index
    %c0_7 = arith.constant 0 : index
    %17 = vector.load %arg9[%c0_6, %c0_7] : memref<128x128xbf16, #tpu.memory_space<vmem>>, vector<128x128xbf16>
    %cst = arith.constant dense<0.000000e+00> : vector<256x128xf32>
    %18 = tpu.matmul %11, %17, %cst {dimension_numbers = #tpu.dot_dimension_numbers<[0], [0], [1], [1], [0, 1, 1, 1], [], []>} : vector<128x256xbf16>, vector<128x128xbf16>, vector<256x128xf32> -> vector<256x128xf32>
    %c0_8 = arith.constant 0 : index
    %c0_9 = arith.constant 0 : index
    %19 = vector.load %arg10[%c0_8, %c0_9] : memref<128x128xbf16, #tpu.memory_space<vmem>>, vector<128x128xbf16>
    %cst_10 = arith.constant dense<0.000000e+00> : vector<256x128xf32>
    %20 = tpu.matmul %16, %19, %cst_10 {dimension_numbers = #tpu.dot_dimension_numbers<[0], [0], [1], [1], [0, 1, 1, 1], [], []>} : vector<128x256xbf16>, vector<128x128xbf16>, vector<256x128xf32> -> vector<256x128xf32>
    %21 = arith.addf %18, %20 : vector<256x128xf32>
    %22 = vector.extract_strided_slice %5 {offsets = [0, 0], sizes = [1, 128], strides = [1, 1]} : vector<8x128xf32> to vector<1x128xf32>
    %23 = vector.broadcast %22 : vector<1x128xf32> to vector<256x128xf32>
    %24 = arith.addf %21, %23 : vector<256x128xf32>
    %cst_11 = arith.constant 0.000000e+00 : f32
    %25 = vector.broadcast %cst_11 : f32 to vector<256x128xf32>
    %26 = arith.maximumf %24, %25 : vector<256x128xf32>
    %27 = arith.truncf %26 : vector<256x128xf32> to vector<256x128xbf16>
    %c2 = arith.constant 2 : index
    %c0_12 = arith.constant 0 : index
    %c0_13 = arith.constant 0 : index
    %28 = vector.load %arg5[%c2, %c0_12, %c0_13] : memref<7x128x128xbf16, #tpu.memory_space<vmem>>, vector<1x128x128xbf16>
    %29 = vector.shape_cast %28 : vector<1x128x128xbf16> to vector<128x128xbf16>
    %cst_14 = arith.constant dense<0.000000e+00> : vector<256x128xf32>
    %30 = tpu.matmul %27, %29, %cst_14 {dimension_numbers = #tpu.dot_dimension_numbers<[1], [0], [0], [1], [0, 0, 1, 1], [], []>} : vector<256x128xbf16>, vector<128x128xbf16>, vector<256x128xf32> -> vector<256x128xf32>
    %31 = vector.extract_strided_slice %5 {offsets = [1, 0], sizes = [1, 128], strides = [1, 1]} : vector<8x128xf32> to vector<1x128xf32>
    %32 = vector.broadcast %31 : vector<1x128xf32> to vector<256x128xf32>
    %33 = arith.addf %30, %32 : vector<256x128xf32>
    %34 = math.tanh %33 : vector<256x128xf32>
    %35 = tpu.iota {dimensions = array<i32: 0>} : vector<64x256xi32>
    %c64_i32 = arith.constant 64 : i32
    %36 = arith.muli %arg0, %c64_i32 : i32
    %37 = vector.broadcast %36 : i32 to vector<64x256xi32>
    %38 = arith.addi %35, %37 : vector<64x256xi32>
    %39 = vector.broadcast %4 : vector<1x256xi32> to vector<64x256xi32>
    %40 = arith.cmpi eq, %38, %39 : vector<64x256xi32>
    %41 = arith.extui %40 : vector<64x256xi1> to vector<64x256xi32>
    %42 = arith.sitofp %41 : vector<64x256xi32> to vector<64x256xf32>
    %43 = arith.truncf %42 : vector<64x256xf32> to vector<64x256xbf16>
    %c0_15 = arith.constant 0 : index
    %c0_16 = arith.constant 0 : index
    %44 = vector.load %arg7[%c0_15, %c0_16] : memref<64x128xf32, #tpu.memory_space<vmem>>, vector<64x128xf32>
    %45 = arith.truncf %34 : vector<256x128xf32> to vector<256x128xbf16>
    %cst_17 = arith.constant dense<0.000000e+00> : vector<64x128xf32>
    %46 = tpu.matmul %43, %45, %cst_17 {dimension_numbers = #tpu.dot_dimension_numbers<[1], [0], [0], [1], [0, 0, 1, 1], [], []>} : vector<64x256xbf16>, vector<256x128xbf16>, vector<64x128xf32> -> vector<64x128xf32>
    %47 = arith.addf %44, %46 : vector<64x128xf32>
    %c0_18 = arith.constant 0 : index
    %c0_19 = arith.constant 0 : index
    %48 = vector.load %arg7[%c0_18, %c0_19] : memref<64x128xf32, #tpu.memory_space<vmem>>, vector<64x128xf32>
    tpu.vector_store %arg7[%c0_18, %c0_19], %47 {strides = array<i32>} : memref<64x128xf32, #tpu.memory_space<vmem>>, vector<64x128xf32>,
    %c1_i32 = arith.constant 1 : i32
    %49 = arith.cmpi eq, %arg1, %c1_i32 : i32
    %50 = arith.extui %49 : i1 to i32
    %c0_i32_20 = arith.constant 0 : i32
    %51 = arith.cmpi ne, %50, %c0_i32_20 : i32
    scf.if %51 {
      %c0_21 = arith.constant 0 : index
      %c0_22 = arith.constant 0 : index
      %52 = vector.load %arg7[%c0_21, %c0_22] : memref<64x128xf32, #tpu.memory_space<vmem>>, vector<64x128xf32>
      %53 = arith.truncf %52 : vector<64x128xf32> to vector<64x128xbf16>
      %c3 = arith.constant 3 : index
      %c0_23 = arith.constant 0 : index
      %c0_24 = arith.constant 0 : index
      %54 = vector.load %arg5[%c3, %c0_23, %c0_24] : memref<7x128x128xbf16, #tpu.memory_space<vmem>>, vector<1x128x128xbf16>
      %55 = vector.shape_cast %54 : vector<1x128x128xbf16> to vector<128x128xbf16>
      %cst_25 = arith.constant dense<0.000000e+00> : vector<64x128xf32>
      %56 = tpu.matmul %53, %55, %cst_25 {dimension_numbers = #tpu.dot_dimension_numbers<[1], [0], [0], [1], [0, 0, 1, 1], [], []>} : vector<64x128xbf16>, vector<128x128xbf16>, vector<64x128xf32> -> vector<64x128xf32>
      %57 = vector.extract_strided_slice %5 {offsets = [2, 0], sizes = [1, 128], strides = [1, 1]} : vector<8x128xf32> to vector<1x128xf32>
      %58 = vector.broadcast %57 : vector<1x128xf32> to vector<64x128xf32>
      %59 = arith.addf %56, %58 : vector<64x128xf32>
      %cst_26 = arith.constant 0.000000e+00 : f32
      %60 = vector.broadcast %cst_26 : f32 to vector<64x128xf32>
      %61 = arith.maximumf %59, %60 : vector<64x128xf32>
      %62 = arith.truncf %61 : vector<64x128xf32> to vector<64x128xbf16>
      %c4 = arith.constant 4 : index
      %c0_27 = arith.constant 0 : index
      %c0_28 = arith.constant 0 : index
      %63 = vector.load %arg5[%c4, %c0_27, %c0_28] : memref<7x128x128xbf16, #tpu.memory_space<vmem>>, vector<1x128x128xbf16>
      %64 = vector.shape_cast %63 : vector<1x128x128xbf16> to vector<128x128xbf16>
      %cst_29 = arith.constant dense<0.000000e+00> : vector<64x128xf32>
      %65 = tpu.matmul %62, %64, %cst_29 {dimension_numbers = #tpu.dot_dimension_numbers<[1], [0], [0], [1], [0, 0, 1, 1], [], []>} : vector<64x128xbf16>, vector<128x128xbf16>, vector<64x128xf32> -> vector<64x128xf32>
      %66 = vector.extract_strided_slice %5 {offsets = [3, 0], sizes = [1, 128], strides = [1, 1]} : vector<8x128xf32> to vector<1x128xf32>
      %67 = vector.broadcast %66 : vector<1x128xf32> to vector<64x128xf32>
      %68 = arith.addf %65, %67 : vector<64x128xf32>
      %69 = math.tanh %68 : vector<64x128xf32>
      %c64_i32_30 = arith.constant 64 : i32
      %70 = arith.muli %arg0, %c64_i32_30 : i32
      %71 = tpu.assume_multiple %70, 64 : i32
      %72 = arith.index_cast %71 : i32 to index
      %c0_31 = arith.constant 0 : index
      %73 = vector.load %arg8[%72, %c0_31] : memref<128x128xbf16, #tpu.memory_space<vmem>>, vector<64x128xbf16>
      %c5 = arith.constant 5 : index
      %c0_32 = arith.constant 0 : index
      %c0_33 = arith.constant 0 : index
      %74 = vector.load %arg5[%c5, %c0_32, %c0_33] : memref<7x128x128xbf16, #tpu.memory_space<vmem>>, vector<1x128x128xbf16>
      %75 = vector.shape_cast %74 : vector<1x128x128xbf16> to vector<128x128xbf16>
      %cst_34 = arith.constant dense<0.000000e+00> : vector<64x128xf32>
      %76 = tpu.matmul %73, %75, %cst_34 {dimension_numbers = #tpu.dot_dimension_numbers<[1], [0], [0], [1], [0, 0, 1, 1], [], []>} : vector<64x128xbf16>, vector<128x128xbf16>, vector<64x128xf32> -> vector<64x128xf32>
      %77 = vector.extract_strided_slice %5 {offsets = [4, 0], sizes = [1, 128], strides = [1, 1]} : vector<8x128xf32> to vector<1x128xf32>
      %78 = vector.broadcast %77 : vector<1x128xf32> to vector<64x128xf32>
      %79 = arith.addf %76, %78 : vector<64x128xf32>
      %cst_35 = arith.constant 0.000000e+00 : f32
      %80 = vector.broadcast %cst_35 : f32 to vector<64x128xf32>
      %81 = arith.maximumf %79, %80 : vector<64x128xf32>
      %82 = arith.truncf %81 : vector<64x128xf32> to vector<64x128xbf16>
      %c6 = arith.constant 6 : index
      %c0_36 = arith.constant 0 : index
      %c0_37 = arith.constant 0 : index
      %83 = vector.load %arg5[%c6, %c0_36, %c0_37] : memref<7x128x128xbf16, #tpu.memory_space<vmem>>, vector<1x128x128xbf16>
      %84 = vector.shape_cast %83 : vector<1x128x128xbf16> to vector<128x128xbf16>
      %cst_38 = arith.constant dense<0.000000e+00> : vector<64x128xf32>
      %85 = tpu.matmul %82, %84, %cst_38 {dimension_numbers = #tpu.dot_dimension_numbers<[1], [0], [0], [1], [0, 0, 1, 1], [], []>} : vector<64x128xbf16>, vector<128x128xbf16>, vector<64x128xf32> -> vector<64x128xf32>
      %86 = vector.extract_strided_slice %5 {offsets = [5, 0], sizes = [1, 128], strides = [1, 1]} : vector<8x128xf32> to vector<1x128xf32>
      %87 = vector.broadcast %86 : vector<1x128xf32> to vector<64x128xf32>
      %88 = arith.addf %85, %87 : vector<64x128xf32>
      %89 = math.tanh %88 : vector<64x128xf32>
      %90 = arith.addf %69, %89 : vector<64x128xf32>
      %c0_39 = arith.constant 0 : index
      %c0_40 = arith.constant 0 : index
      %91 = vector.load %arg7[%c0_39, %c0_40] : memref<64x128xf32, #tpu.memory_space<vmem>>, vector<64x128xf32>
      tpu.vector_store %arg7[%c0_39, %c0_40], %90 {strides = array<i32>} : memref<64x128xf32, #tpu.memory_space<vmem>>, vector<64x128xf32>,
    } else {
    }
    return
  }
  func.func @transform_0(%arg0: i32, %arg1: i32) -> (i32, i32) {
    %c0_i32 = arith.constant 0 : i32
    %c0_i32_0 = arith.constant 0 : i32
    return %c0_i32, %arg1 : i32, i32
  }
  func.func @transform_1(%arg0: i32, %arg1: i32) -> (i32, i32) {
    %c0_i32 = arith.constant 0 : i32
    %c0_i32_0 = arith.constant 0 : i32
    return %c0_i32, %arg1 : i32, i32
  }
  func.func @transform_3(%arg0: i32, %arg1: i32) -> (i32, i32, i32) {
    %c0_i32 = arith.constant 0 : i32
    %c0_i32_0 = arith.constant 0 : i32
    %c0_i32_1 = arith.constant 0 : i32
    %c0_i32_2 = arith.constant 0 : i32
    return %c0_i32, %c0_i32_0, %c0_i32_1 : i32, i32, i32
  }
  func.func @transform_4(%arg0: i32, %arg1: i32) -> (i32, i32) {
    %c0_i32 = arith.constant 0 : i32
    %c0_i32_0 = arith.constant 0 : i32
    %c0_i32_1 = arith.constant 0 : i32
    return %c0_i32, %c0_i32_0 : i32, i32
  }
  func.func @transform_5(%arg0: i32, %arg1: i32) -> (i32, i32) {
    %c0_i32 = arith.constant 0 : i32
    %c0_i32_0 = arith.constant 0 : i32
    return %arg0, %c0_i32 : i32, i32
  }
}

</mosaic_0001>

<bundles_post_ra>
// kernel: tpu_custom_call.1
= control target key start
LH: loop header
LB: loop body
LE: loop exit
PB: predicated region body
PF: predicated region fallthrough
CT: control target
= control target key end

     0   :  { %s5226_s0 = inlined_call_operand.hbm [shape: s32[1,512], index: 0, kind: input, shape index: {}]   ;;  %s5227_s1 = inlined_call_operand.hbm [shape: s32[1,512], index: 1, kind: input, shape index: {}]   ;;  %s5228_s2 = inlined_call_operand.hbm [shape: bf16[128,128], index: 2, kind: input, shape index: {}]   ;;  %s5229_s3 = inlined_call_operand.hbm [shape: bf16[7,128,128], index: 3, kind: input, shape index: {}]   ;;  %s5230_s4 = inlined_call_operand.hbm [shape: f32[8,128], index: 4, kind: input, shape index: {}]   ;;  %s5231_s5 = inlined_call_operand.hbm [shape: f32[128,128], index: 5, kind: output, shape index: {}]  }
   0x1   :  { %5242 = sst [smem:[#allocation31_spill]] %s5229_s3 }
   0x2   :  { %5243 = sst [smem:[#allocation32_spill]] %s5230_s4 }
   0x3   :  { %5244 = sst [smem:[#allocation33_spill]] %s5231_s5 }
   0x4   :  { %10 = vsyncpa [#allocation7], 0 }
   0x5   :  { %12 = vsyncpa [#allocation7 + $0x1], 0 }
   0x6   :  { %13 = vsyncpa [#allocation10], 0 }
   0x7   :  { %15 = vsyncpa [#allocation10 + $0x1], 0 }
   0x8   :  { %16 = vsyncpa [#allocation13], 0 }
   0x9   :  { %17 = vsyncpa [#allocation8], 0 }
   0xa   :  { %19 = vsyncpa [#allocation8 + $0x1], 0  ;;  %s4441_s18 = smov 0   ;;  %s4443_s19 = smov 0  }
   0xb   :  { %s4445_s20 = smov 0   ;;  %s4447_s21 = smov 0  }
   0xc   :  { %s4449_s22 = smov 0   ;;  %s4451_s23 = smov 0  }
   0xd   :  { %s4453_s24 = smov 0   ;;  %s4455_s25 = smov 0  }
   0xe   :  { %s4457_s26 = smov 0   ;;  %s4459_s27 = smov 0  }
   0xf   :  { %s4461_s28 = smov 0  }
  0x10 LB: > { %5245 = sst [smem:[#allocation25_spill]] %s4356_s18  ;;  %s4495_s29 = sadd.s32 4294967295, %s4396_s28   ;;  %s4396_s28 = sphi %s4461_s28, %s25_s28   ;;  %s4392_s27 = sphi %s4459_s27, %s5275_s27   ;;  %s4388_s26 = sphi %s4457_s26, %s5283_s26   ;;  %s4384_s25 = sphi %s4455_s25, %s5273_s25   ;;  %s4380_s24 = sphi %s4453_s24, %s5282_s24   ;;  %s4376_s23 = sphi %s4451_s23, %s5281_s23   ;;  %s4372_s22 = sphi %s4449_s22, %s5280_s22   ;;  %s4368_s21 = sphi %s4447_s21, %s5279_s21   ;;  %s4364_s20 = sphi %s4445_s20, %s5278_s20   ;;  %s4360_s19 = sphi %s4443_s19, %s5277_s19   ;;  %s4356_s18 = sphi %s4441_s18, %s5276_s18  }
  0x11   : > { %5246 = sst [smem:[#allocation26_spill]] %s4392_s27  ;;  %s2954_s30 = sadd.s32 4294967294, %s4396_s28  }
  0x12   : > { %p57_p0 = scmp.ne.s32.totalorder %s4372_s22, %s4368_s21  ;;  %p5232_p1 = scmp.eq.s32.totalorder %s4495_s29, 0 }
  0x13   : > { %p148_p2 = scmp.ne.s32.totalorder %s4364_s20, %s4360_s19  ;;  %p149_p4 = scmp.eq.s32.totalorder %s4495_s29, 3 }
  0x14   : > { %p4505_p3 = por %p5232_p1, %p57_p0  ;;  %p154_p5 = scmp.ne.s32.totalorder %s4360_s19, %s4356_s18 }
  0x15   : > { %p155_p6 = scmp.eq.s32.totalorder %s2954_s30, 3  ;;  %p4512_p7 = por %p149_p4, %p148_p2 }
  0x16   : > { %p2955_p8 = scmp.ge.s32.totalorder %s4396_s28, 1  ;;  %p162_p10 = scmp.lt.s32.totalorder %s4396_s28, 5 }
  0x17   : > { %s5248_s8 = scalar_select %p4512_p7, 1, 0 }
  0x18   : > { %p4517_p9 = por %p155_p6, %p154_p5  ;;  %p4522_p11 = pnand %p2955_p8, %p162_p10 }
  0x19   : > { %5249 = sst [smem:[#allocation27_spill]] %s5248_s8  ;;  %s4398_s11 = smov [#allocation11]  }
  0x1a   : > { %s5250_s9 = scalar_select %p4517_p9, 1, 0 }
  0x1b   : > { %s174_s12 = sshll.u32 %s4398_s11, 4  ;;  %p3832_p12 = pneg %p4522_p11  ;;  %s175_s12 = int_to_ptr.vmem [resolvable:$true] %s174_s12 }
  0x1c   : > { %5251 = sst [smem:[#allocation28_spill]] %s5250_s9  ;;  %s4399_s14 = smov [#allocation12]  }
  0x1d   : > { %p4530_p13 = pnand %p3832_p12, %p5232_p1  ;;  %s188_s15 = sshll.u32 %s4399_s14, 4  ;;  %s189_s15 = int_to_ptr.vmem [resolvable:$true] %s188_s15 }
  0x1e   : > { %s4145_s16 = scalar_lea.vmem %s175_s12, 7168  ;;  %p4153_p6 = scmp.lt.s32.totalorder %s175_s12, %s175_s12 }
  0x1f   : > { %p4136_p0 = pneg %p4530_p13  ;;  %p4146_p2 = scmp.ne.s32.totalorder %s175_s12, %s4145_s16 }
  0x20   : > { %p4154_p8 = scmp.lt.s32.totalorder %s4145_s16, %s4145_s16 }
  0x21   : > { %p4148_p4 = pnand %p4146_p2, %p4136_p0 }
  0x22   : > { %p4155_p10 = por %p4154_p8, %p4153_p6 }
  0x23   : > { %p4149_p5 = pneg %p4148_p4 }
  0x25   : > { %p4156_p12 = pnand %p4155_p10, %p4149_p5 }
  0x27   : > { %4159 = shalt.err (!%p4156_p12)
}
  0x28   : > { %s4400_s17 = smov 64   ;;  %s4401_s21 = smov 4  }
  0x29   : > { %s5254_s3 = sld [smem:[#allocation31_spill]]  ;;  %s4171_s14 = scalar_lea.vmem %s189_s15, 128 }
  0x2a   : > { %p4172_p1 = scmp.ne.s32.totalorder %s189_s15, %s4171_s14  ;;  %p4179_p9 = scmp.lt.s32.totalorder %s189_s15, %s189_s15 }
  0x2b   : > { %p4180_p7 = scmp.lt.s32.totalorder %s4171_s14, %s4171_s14 }
  0x2c   : > { %p4174_p2 = pnand %p4172_p1, %p4136_p0 }
  0x2d   : > { %p4181_p6 = por %p4180_p7, %p4179_p9 }
  0x2e   : > { %p4175_p4 = pneg %p4174_p2 }
  0x2f   : > { %3835 = dma.hbm_to_vmem [thread:$0]  (!%p4530_p13), %s5254_s3, 7168, %s175_s12, [#allocation10], %s4400_s17, %s4400_s17, %s4401_s21  }
  0x30   : > { %p4182_p5 = pnand %p4181_p6, %p4175_p4 }
  0x32   : > { %4185 = shalt.err (!%p4182_p5)
}
  0x33   : > { %s5255_s4 = sld [smem:[#allocation32_spill]]  ;;  %s34_s12 = sadd.s32 1, %s4388_s26 }
  0x34   : > { %s37_s17 = sadd.s32 1, %s4392_s27  ;;  %p35_p1 = scmp.ge.s32.totalorder %s34_s12, 2 }
  0x35   : > { %s44_s13 = sadd.s32 1, %s4376_s23  ;;  %p51_p7 = scmp.ne.s32.totalorder %s4376_s23, %s4372_s22 }
  0x36   : > { %p52_p9 = scmp.eq.s32.totalorder %s4396_s28, 0  ;;  %s5285_s12 = smov (%p35_p1, %s34_s12), 0 }
  0x37   : > { %5256 = sst [smem:[#allocation29_spill]] %s5285_s12  ;;  %s5287_s17 = smov (!%p35_p1, %s37_s17), %s4392_s27 }
  0x38   : > { %s41_s6 = ssub.s32 %s4388_s26, %s5285_s12  ;;  %p4563_p0 = por %p52_p9, %p51_p7 }
  0x39   : > { %3838 = dma.hbm_to_vmem [thread:$0]  (!%p4530_p13), %s5255_s4, 128, %s189_s15, [#allocation13]  }
  0x3a   : > { %p39_p13 = scmp.ge.s32.totalorder %s5287_s17, 2  ;;  %p42_p8 = scmp.eq.s32.totalorder %s41_s6, 0 }
  0x3b   : > { %p3852_p10 = scmp.lt.s32.totalorder %s4396_s28, 4  ;;  %s199_s15 = sand.u32 1, %s4376_s23  }
  0x3c   : > { %s5289_s17 = smov (%p39_p13, %s5287_s17), 0  ;;  %s2959_s14 = sshll.u32 %s199_s15, 1 }
  0x3d   : > { %5258 = sst [smem:[#allocation30_spill]] %s5289_s17  ;;  %s135_s11 = ssub.s32 %s4392_s27, %s5289_s17 }
  0x3e   : > { %s4572_s30 = scalar_select %p42_p8, %s4376_s23, %s44_s13  }
  0x3f   : > { %p136_p12 = scmp.eq.s32.totalorder %s135_s11, 0  ;;  %s3193_s16 = sshll.u32 %s4388_s26, 5 }
  0x40   : > { %s5259_s3 = sadd.s32 1, %s4364_s20  ;;  %s209_s18 = scalar_lea.hbm %s5226_s0, %s3193_s16 }
  0x41   : > { %s4580_s4 = scalar_select %p136_p12, %s4364_s20, %s5259_s3  }
  0x42   : > { %s203_s6 = scalar_lea.vmem [#allocation6], %s2959_s14  ;;  %p4589_p2 = pnand %p3852_p10, %p4563_p0 }
  0x43   : > { %s211_s5 = sshll.u32 %s203_s6, 4  ;;  %s4596_s3 = scalar_lea.hbm %s5227_s1, %s3193_s16  ;;  %s212_s5 = int_to_ptr.vmem [resolvable:$true] %s211_s5 }
  0x44   : > { %s218_s17 = sand.u32 1, %s4396_s28   ;;  %s200_s27 = scalar_lea.sflag [#allocation7], %s199_s15 }
  0x45   : > { %p4188_p4 = pneg %p4589_p2  ;;  %s4199_s9 = scalar_lea.vmem %s212_s5, 32 }
  0x46   : > { %p4200_p6 = scmp.ne.s32.totalorder %s212_s5, %s4199_s9  ;;  %s4402_s12 = smov [#allocation6]  }
  0x47   : > { %s4204_s21 = sshll.u32 %s4402_s12, 4  ;;  %s4205_s21 = int_to_ptr.vmem [resolvable:$false] %s4204_s21 }
  0x48   : > { %p4202_p5 = pnand %p4200_p6, %p4188_p4  ;;  %s4206_s6 = scalar_lea.vmem %s4205_s21, 64 }
  0x49   : > { %p4207_p7 = scmp.lt.s32.totalorder %s212_s5, %s4205_s21  ;;  %p4208_p9 = scmp.lt.s32.totalorder %s4206_s6, %s4199_s9 }
  0x4a   : > { %p4203_p1 = pneg %p4202_p5 }
  0x4b   : > { %p4209_p0 = por %p4208_p9, %p4207_p7 }
  0x4d   : > { %p4210_p13 = pnand %p4209_p0, %p4203_p1 }
  0x4f   : > { %4213 = shalt.err (!%p4210_p13)
}
  0x50   : > { %3842 = dma.hbm_to_vmem [thread:$0]  (!%p4589_p2), %s209_s18, 32, %s212_s5, %s200_s27  }
  0x51   : > { %s222_s15 = scalar_lea.vmem [#allocation9], %s2959_s14  ;;  %s219_s13 = scalar_lea.sflag [#allocation10], %s218_s17 }
  0x52   : > { %s230_s16 = sshll.u32 %s222_s15, 4  ;;  %s4403_s12 = smov [#allocation9]   ;;  %s231_s16 = int_to_ptr.vmem [resolvable:$true] %s230_s16 }
  0x53   : > { %s4227_s11 = scalar_lea.vmem %s231_s16, 32  ;;  %s4232_s21 = sshll.u32 %s4403_s12, 4  ;;  %s4233_s21 = int_to_ptr.vmem [resolvable:$false] %s4232_s21 }
  0x54   : > { %p4228_p8 = scmp.ne.s32.totalorder %s231_s16, %s4227_s11  ;;  %s4234_s9 = scalar_lea.vmem %s4233_s21, 64 }
  0x55   : > { %p4235_p6 = scmp.lt.s32.totalorder %s231_s16, %s4233_s21  ;;  %p4236_p5 = scmp.lt.s32.totalorder %s4234_s9, %s4227_s11 }
  0x56   : > { %p4230_p10 = pnand %p4228_p8, %p4188_p4 }
  0x57   : > { %p4237_p1 = por %p4236_p5, %p4235_p6 }
  0x58   : > { %p4231_p12 = pneg %p4230_p10 }
  0x5a   : > { %p4238_p7 = pnand %p4237_p1, %p4231_p12 }
  0x5c   : > { %4241 = shalt.err (!%p4238_p7)
}
  0x5d   : > { %3845 = dma.hbm_to_vmem [thread:$0]  (!%p4589_p2), %s4596_s3, 32, %s231_s16, %s219_s13  }
  0x5e   : > { %239 = sbr.rel (%p4522_p11) target bundleno = 1762 (0x6e2), region = 36  ;;  %s241_s5 = sand.u32 (!%p4522_p11), 1, %s4372_s22  }
  0x5f   : > { %s4615_s18 = sshll.u32 (!%p4522_p11), %s241_s5, 1  ;;  %s242_s27 = scalar_lea.sflag (!%p4522_p11), [#allocation7], %s241_s5 }
  0x60   : > { %s245_s17 = scalar_lea.vmem (!%p4522_p11), [#allocation6], %s4615_s18 }
  0x63   : > { %4333 = dma.done.wait (%p4505_p3), %s242_s27, 32  }
  0x64   : > { %4335 = vsyncadd (%p4505_p3), %s242_s27, 4294967264  ;;  %s250_s8 = sand.u32 1, %s4495_s29   ;;  %s254_s10 = scalar_lea.vmem [#allocation9], %s4615_s18 }
  0x65   : > { %s251_s14 = scalar_lea.sflag [#allocation10], %s250_s8 }
  0x66   : > { %4337 = dma.done.wait (%p4505_p3), %s251_s14, 32  }
  0x67   : > { %4339 = vsyncadd (%p4505_p3), %s251_s14, 4294967264  ;;  %p5261_p11 = scmp.eq.s32.totalorder %s4495_s29, 0 }
  0x69   : > { %4341 = dma.done.wait (%p5261_p11), [#allocation10], 7168   ;;  %p5262_p2 = pmov %p5261_p11 }
  0x6b   : > { %4343 = vsyncadd (%p5262_p2), [#allocation10], 4294960128  ;;  %p5263_p4 = pmov %p5262_p2 }
  0x6c   : > { %p5264_p9 = pmov %p5262_p2 }
  0x6d   : > { %4345 = dma.done.wait (%p5263_p4), [#allocation13], 128  }
  0x6e   : > { %4347 = vsyncadd (%p5264_p9), [#allocation13], 4294967168  ;;  %s289_s3 = sand.u32 1, %s4360_s19   ;;  %p2971_p3 = scmp.ne.s32.totalorder %s4380_s24, 0 }
  0x6f   : > { %s2970_s6 = sshll.u32 %s289_s3, 6  ;;  %s4404_s7 = smov (!%p2971_p3), [#allocation2]  }
  0x70   : > { %s4639_s15 = scalar_lea.vmem [#allocation14], %s2970_s6  ;;  %299 = sbr.rel (%p2971_p3) target bundleno = 384 (0x180), region = 56 }
  0x71   : > { %s307_s16 = sshll.u32 (!%p2971_p3), %s4404_s7, 4  ;;  %s308_s16 = int_to_ptr.vmem [resolvable:$true] %s307_s16 }
  0x72   : > { %s4250_s13 = scalar_lea.vmem (!%p2971_p3), %s308_s16, 1024  ;;  %p4255_p13 = scmp.lt.s32.totalorder (!%p2971_p3), %s308_s16, %s308_s16 }
  0x73   : > { %p4251_p0 = scmp.ne.s32.totalorder (!%p2971_p3), %s308_s16, %s4250_s13  ;;  %p4256_p8 = scmp.lt.s32.totalorder (!%p2971_p3), %s4250_s13, %s4250_s13 }
  0x75   : > { %p4257_p10 = por %p4256_p8, %p4255_p13 }
  0x77   : > { %p4258_p12 = pnand %p4257_p10, %p4251_p0 }
  0x79   : > { %4261 = shalt.err (!%p4258_p12)  }
  0x7a   : > { %310 = dma.hbm_to_vmem [thread:$0]  %s5228_s2, 1024, %s308_s16, [#allocation5] }
  0x7b   : > { %4348 = dma.done.wait [#allocation5], 1024 }
  0x7c   : > { %4349 = vsyncadd [#allocation5], 4294966272  ;;  %v4405_v0 = vmov 0.0   ;;  %v3954_v1 = vld [vmem:[#allocation11 + $0x38] sm:$0xff]   ;;  %v3956_v3 = vld [vmem:[#allocation11 + $0x30] sm:$0xff]  }
  0x7d   : > { %862 = vst [vmem:[%s4639_s15] sm:$0xff] %v4405_v0  ;;  %863 = vst [vmem:[%s4639_s15 + $0x8] sm:$0xff] %v4405_v0  ;;  %v3955_v2 = vld [vmem:[#allocation11 + $0x78] sm:$0xff]   ;;  %3514 = vmatprep.subr.bf16.mxu0 %v3954_v1  ;;  %v3957_v4 = vld [vmem:[#allocation11 + $0x70] sm:$0xff]  }
  0x7e   : > { %864 = vst [vmem:[%s4639_s15 + $0x10] sm:$0xff] %v4405_v0  ;;  %865 = vst [vmem:[%s4639_s15 + $0x18] sm:$0xff] %v4405_v0  ;;  %3546 = vmatprep.subr.bf16.mxu1 %v3955_v2  ;;  %3515 = vmatpush3.bf16.msra.mxu0 %v3954_v1  ;;  %v3958_v5 = vld [vmem:[#allocation11 + $0x28] sm:$0xff]   ;;  %v3960_v7 = vld [vmem:[#allocation11 + $0x20] sm:$0xff]  }
  0x7f   : > { %866 = vst [vmem:[%s4639_s15 + $0x20] sm:$0xff] %v4405_v0  ;;  %867 = vst [vmem:[%s4639_s15 + $0x28] sm:$0xff] %v4405_v0  ;;  %3547 = vmatpush3.bf16.msra.mxu1 %v3955_v2  ;;  %3516 = vmatprep.subr.bf16.mxu0 %v3956_v3  ;;  %v3959_v6 = vld [vmem:[#allocation11 + $0x68] sm:$0xff]   ;;  %v3961_v8 = vld [vmem:[#allocation11 + $0x60] sm:$0xff]  }
  0x80   : > { %868 = vst [vmem:[%s4639_s15 + $0x30] sm:$0xff] %v4405_v0  ;;  %869 = vst [vmem:[%s4639_s15 + $0x38] sm:$0xff] %v4405_v0  ;;  %3548 = vmatprep.subr.bf16.mxu1 %v3957_v4  ;;  %v3962_v9 = vld [vmem:[#allocation11 + $0x18] sm:$0xff]   ;;  %v3964_v11 = vld [vmem:[#allocation11 + $0x10] sm:$0xff]  }
  0x81   : > { %v3963_v10 = vld [vmem:[#allocation11 + $0x58] sm:$0xff]   ;;  %v3965_v13 = vld [vmem:[#allocation11 + $0x50] sm:$0xff]   ;;  %v3966_v14 = vld [vmem:[#allocation11 + $0x8] sm:$0xff]  }
  0x82   : > { %3517 = vmatpush3.bf16.msra.mxu0 %v3956_v3  ;;  %v3970_v12 = vld [vmem:[#allocation2] sm:$0xff]   ;;  %v3967_v15 = vld [vmem:[#allocation11 + $0x48] sm:$0xff]   ;;  %v3968_v16 = vld [vmem:[#allocation11] sm:$0xff]  }
  0x83   : > { %3549 = vmatpush3.bf16.msra.mxu1 %v3957_v4  ;;  %3518 = vmatprep.subr.bf16.mxu0 %v3958_v5  ;;  %v3969_v17 = vld [vmem:[#allocation11 + $0x40] sm:$0xff]   ;;  %v3972_v19 = vld [vmem:[#allocation2 + $0x10] sm:$0xff]   ;;  %v3973_v20 = vld [vmem:[#allocation2 + $0x18] sm:$0xff]  }
  0x84   : > { %3550 = vmatprep.subr.bf16.mxu1 %v3959_v6  ;;  %3530 = vmatprep.mubr.bf16.mxu0 %v3970_v12  ;;  %v3971_v18 = vld [vmem:[#allocation2 + $0x8] sm:$0xff]   ;;  %v3974_v21 = vld [vmem:[#allocation2 + $0x20] sm:$0xff]   ;;  %v3976_v23 = vld [vmem:[#allocation2 + $0x30] sm:$0xff]  }
  0x85   : > { %3562 = vmatprep.mubr.bf16.mxu1 %v3970_v12  ;;  %v3975_v22 = vld [vmem:[#allocation2 + $0x28] sm:$0xff]   ;;  %v3977_v24 = vld [vmem:[#allocation2 + $0x38] sm:$0xff]  }
  0x86   : > { %3519 = vmatpush3.bf16.msra.mxu0 %v3958_v5 }
  0x87   : > { %3551 = vmatpush3.bf16.msra.mxu1 %v3959_v6  ;;  %3520 = vmatprep.subr.bf16.mxu0 %v3960_v7 }
  0x88   : > { %3552 = vmatprep.subr.bf16.mxu1 %v3961_v8 }
  0x8a   : > { %3521 = vmatpush3.bf16.msra.mxu0 %v3960_v7 }
  0x8b   : > { %3553 = vmatpush3.bf16.msra.mxu1 %v3961_v8  ;;  %3522 = vmatprep.subr.bf16.mxu0 %v3962_v9 }
  0x8c   : > { %3554 = vmatprep.subr.bf16.mxu1 %v3963_v10 }
  0x8e   : > { %3523 = vmatpush3.bf16.msra.mxu0 %v3962_v9 }
  0x8f   : > { %3555 = vmatpush3.bf16.msra.mxu1 %v3963_v10  ;;  %3524 = vmatprep.subr.bf16.mxu0 %v3964_v11 }
  0x90   : > { %3556 = vmatprep.subr.bf16.mxu1 %v3965_v13 }
  0x92   : > { %3525 = vmatpush3.bf16.msra.mxu0 %v3964_v11 }
  0x93   : > { %3557 = vmatpush3.bf16.msra.mxu1 %v3965_v13  ;;  %3526 = vmatprep.subr.bf16.mxu0 %v3966_v14 }
  0x94   : > { %3558 = vmatprep.subr.bf16.mxu1 %v3967_v15 }
  0x96   : > { %3527 = vmatpush3.bf16.msra.mxu0 %v3966_v14 }
  0x97   : > { %3559 = vmatpush3.bf16.msra.mxu1 %v3967_v15  ;;  %3528 = vmatprep.subr.bf16.mxu0 %v3968_v16 }
  0x98   : > { %3560 = vmatprep.subr.bf16.mxu1 %v3969_v17 }
  0x9a   : > { %3529 = vmatpush3.bf16.msra.mxu0 %v3968_v16 }
  0x9b   : > { %3561 = vmatpush3.bf16.msra.mxu1 %v3969_v17 }
  0x9d   : > { %3531 = vmatmul.mubr.bf16.vlgmr.msra.gmra.mxu0 %v3971_v18 }
  0x9e   : > { %3563 = vmatmul.mubr.bf16.vlgmr.msra.gmra.mxu1 %v3971_v18  ;;  %3534 = vmatprep.mubr.bf16.mxu0 %v3972_v19 }
  0x9f   : > { %3566 = vmatprep.mubr.bf16.mxu1 %v3972_v19 }
  0xa5   : > { %3535 = vmatmul.mubr.bf16.gmra.mxu0 %v3973_v20 }
  0xa6   : > { %3567 = vmatmul.mubr.bf16.gmra.mxu1 %v3973_v20  ;;  %3538 = vmatprep.mubr.bf16.mxu0 %v3974_v21 }
  0xa7   : > { %3570 = vmatprep.mubr.bf16.mxu1 %v3974_v21 }
  0xad   : > { %3539 = vmatmul.mubr.bf16.gmra.mxu0 %v3975_v22 }
  0xae   : > { %3571 = vmatmul.mubr.bf16.gmra.mxu1 %v3975_v22  ;;  %3542 = vmatprep.mubr.bf16.mxu0 %v3976_v23 }
  0xaf   : > { %3574 = vmatprep.mubr.bf16.mxu1 %v3976_v23 }
  0xb5   : > { %3543 = vmatmul.mubr.bf16.gmra.mxu0 %v3977_v24 }
  0xb6   : > { %3575 = vmatmul.mubr.bf16.gmra.mxu1 %v3977_v24 }
 0x15d   : > { %v3532_v25 = vpop.f32.mrf.mxu0 }
 0x15e   : > { %v3564_v26 = vpop.f32.mrf.mxu1 }
 0x15f   : > { %v477_v27 = vpop.f32.mrf.mxu0 }
 0x160   : > { %v719_v28 = vpop.f32.mrf.mxu1 }
 0x161   : > { %v3533_v29 = vpop.f32.mrf.mxu0 }
 0x162   : > { %v3236_v30 = vpack.c.bf16 %v3533_v29, %v3532_v25  ;;  %v3565_v31 = vpop.f32.mrf.mxu1 }
 0x163   : > { %v3276_v32 = vpack.c.bf16 %v3565_v31, %v3564_v26  ;;  %v480_v33 = vpop.f32.mrf.mxu0 }
 0x164   : > { %3308 = vst [vmem:[#allocation3 + $0x8] sm:$0xff] %v3236_v30   ;;  %v3231_v34 = vpack.c.bf16 %v480_v33, %v477_v27  ;;  %v722_v35 = vpop.f32.mrf.mxu1 }
 0x165   : > { %3315 = vst [vmem:[#allocation4 + $0x8] sm:$0xff] %v3276_v32   ;;  %v3271_v36 = vpack.c.bf16 %v722_v35, %v719_v28  ;;  %v3536_v37 = vpop.f32.mrf.mxu0 }
 0x166   : > { %3232 = vst [vmem:[#allocation3] sm:$0xff] %v3231_v34   ;;  %v3568_v38 = vpop.f32.mrf.mxu1 }
 0x167   : > { %3272 = vst [vmem:[#allocation4] sm:$0xff] %v3271_v36   ;;  %v493_v39 = vpop.f32.mrf.mxu0 }
 0x168   : > { %v735_v40 = vpop.f32.mrf.mxu1 }
 0x169   : > { %v3537_v41 = vpop.f32.mrf.mxu0 }
 0x16a   : > { %v3246_v42 = vpack.c.bf16 %v3537_v41, %v3536_v37  ;;  %v3569_v43 = vpop.f32.mrf.mxu1 }
 0x16b   : > { %v3286_v44 = vpack.c.bf16 %v3569_v43, %v3568_v38  ;;  %v496_v45 = vpop.f32.mrf.mxu0 }
 0x16c   : > { %3310 = vst [vmem:[#allocation3 + $0x18] sm:$0xff] %v3246_v42   ;;  %v3241_v46 = vpack.c.bf16 %v496_v45, %v493_v39  ;;  %v738_v47 = vpop.f32.mrf.mxu1 }
 0x16d   : > { %3317 = vst [vmem:[#allocation4 + $0x18] sm:$0xff] %v3286_v44   ;;  %v3281_v48 = vpack.c.bf16 %v738_v47, %v735_v40  ;;  %v3540_v49 = vpop.f32.mrf.mxu0 }
 0x16e   : > { %3309 = vst [vmem:[#allocation3 + $0x10] sm:$0xff] %v3241_v46   ;;  %v3572_v50 = vpop.f32.mrf.mxu1 }
 0x16f   : > { %3316 = vst [vmem:[#allocation4 + $0x10] sm:$0xff] %v3281_v48   ;;  %v509_v51 = vpop.f32.mrf.mxu0 }
 0x170   : > { %v751_v52 = vpop.f32.mrf.mxu1 }
 0x171   : > { %v3541_v53 = vpop.f32.mrf.mxu0 }
 0x172   : > { %v3256_v54 = vpack.c.bf16 %v3541_v53, %v3540_v49  ;;  %v3573_v55 = vpop.f32.mrf.mxu1 }
 0x173   : > { %v3296_v56 = vpack.c.bf16 %v3573_v55, %v3572_v50  ;;  %v512_v57 = vpop.f32.mrf.mxu0 }
 0x174   : > { %3312 = vst [vmem:[#allocation3 + $0x28] sm:$0xff] %v3256_v54   ;;  %v3251_v58 = vpack.c.bf16 %v512_v57, %v509_v51  ;;  %v754_v59 = vpop.f32.mrf.mxu1 }
 0x175   : > { %3319 = vst [vmem:[#allocation4 + $0x28] sm:$0xff] %v3296_v56   ;;  %v3291_v60 = vpack.c.bf16 %v754_v59, %v751_v52  ;;  %v3544_v61 = vpop.f32.mrf.mxu0 }
 0x176   : > { %3311 = vst [vmem:[#allocation3 + $0x20] sm:$0xff] %v3251_v58   ;;  %v3576_v62 = vpop.f32.mrf.mxu1 }
 0x177   : > { %3318 = vst [vmem:[#allocation4 + $0x20] sm:$0xff] %v3291_v60   ;;  %v525_v63 = vpop.f32.mrf.mxu0 }
 0x178   : > { %v767_v0 = vpop.f32.mrf.mxu1 }
 0x179   : > { %v3545_v1 = vpop.f32.mrf.mxu0 }
 0x17a   : > { %v3266_v2 = vpack.c.bf16 %v3545_v1, %v3544_v61  ;;  %v3577_v3 = vpop.f32.mrf.mxu1 }
 0x17b   : > { %v3306_v4 = vpack.c.bf16 %v3577_v3, %v3576_v62  ;;  %v528_v5 = vpop.f32.mrf.mxu0 }
 0x17c   : > { %3314 = vst [vmem:[#allocation3 + $0x38] sm:$0xff] %v3266_v2   ;;  %v3261_v6 = vpack.c.bf16 %v528_v5, %v525_v63  ;;  %v770_v7 = vpop.f32.mrf.mxu1 }
 0x17d   : > { %3321 = vst [vmem:[#allocation4 + $0x38] sm:$0xff] %v3306_v4   ;;  %v3301_v8 = vpack.c.bf16 %v770_v7, %v767_v0 }
 0x17e   : > { %3313 = vst [vmem:[#allocation3 + $0x30] sm:$0xff] %v3261_v6  }
 0x17f   : > { %3320 = vst [vmem:[#allocation4 + $0x30] sm:$0xff] %v3301_v8  }
 0x180 PF: > { %v873_v9 = vlaneseq  ;;  %v4655_v10 = vld [vmem:[%s254_s10] sm:$0x3]  ;;  %v4659_v11 = vld [vmem:[%s245_s17] sm:$0x3]  ;;  %v3982_v31 = vld [vmem:[#allocation4 + $0x28] sm:$0xff]   ;;  %v4406_v33 = vmov 0.0  }
 0x181   : > { %v3983_v32 = vld [vmem:[#allocation3 + $0x28] sm:$0xff]   ;;  %v3984_v40 = vld [vmem:[#allocation4 + $0x20] sm:$0xff]   ;;  %v3986_v51 = vld [vmem:[#allocation4 + $0x18] sm:$0xff]   ;;  %s3116_s12 = sshll.u32 %s4384_s25, 6  ;;  %p3149_p6 = scmp.ne.s32.totalorder %s4380_s24, 1 }
 0x182   : > { %v4661_v13 = vshrl.u32 %v873_v9, 7  ;;  %v3985_v43 = vld [vmem:[#allocation3 + $0x20] sm:$0xff]   ;;  %v3987_v52 = vld [vmem:[#allocation3 + $0x18] sm:$0xff]   ;;  %v3988_v58 = vld [vmem:[#allocation4 + $0x10] sm:$0xff]   ;;  %s2465_s24 = sshra.s32 (!%p3149_p6), %s3116_s12, 3 }
 0x183   : > { %v3979_v14 = vld [vmem:[#allocation3 + $0x38] sm:$0xff]   ;;  %v3989_v61 = vld [vmem:[#allocation3 + $0x10] sm:$0xff]   ;;  %v3990_v6 = vld [vmem:[#allocation4 + $0x8] sm:$0xff]   ;;  %s3166_s21 = sshll.u32 (!%p3149_p6), %s2465_s24, 2 }
 0x184   : > { %v3978_v12 = vld [vmem:[#allocation4 + $0x38] sm:$0xff]   ;;  %v4664_v16 = vadd.s32 8, %v4661_v13  ;;  %v4667_v17 = vsub.s32 0, %v4661_v13  ;;  %v4670_v18 = vadd.s32 16, %v4661_v13  ;;  %3626 = vmatprep.subr.bf16.mxu1 %v3979_v14  ;;  %v4673_v19 = vadd.s32 24, %v4661_v13  ;;  %v3991_v7 = vld [vmem:[#allocation3 + $0x8] sm:$0xff]  }
 0x185   : > { %3578 = vmatprep.subr.bf16.mxu0 %v3978_v12  ;;  %v4676_v20 = vadd.s32 32, %v4661_v13  ;;  %v4679_v21 = vadd.s32 40, %v4661_v13  ;;  %v4682_v22 = vadd.s32 48, %v4661_v13  ;;  %3627 = vmatpush3.bf16.msra.mxu1 %v3979_v14  ;;  %v4693_v25 = vadd.s32 56, %v4661_v13  ;;  %v3981_v26 = vld [vmem:[#allocation3 + $0x30] sm:$0xff]   ;;  %s5127_s9 = scalar_lea.vmem (!%p3149_p6), [#allocation2], %s3166_s21 }
 0x186   : > { %v3980_v15 = vld [vmem:[#allocation4 + $0x30] sm:$0xff]   ;;  %3579 = vmatpush3.bf16.msra.mxu0 %v3978_v12  ;;  %v4686_v23 = vrot.slane %v4655_v10, %v4667_v17  ;;  %v4690_v24 = vrot.slane %v4659_v11, %v4667_v17  ;;  %v4696_v27 = vadd.s32 64, %v4661_v13  ;;  %v4699_v28 = vadd.s32 72, %v4661_v13  ;;  %3628 = vmatprep.subr.bf16.mxu1 %v3981_v26 }
 0x187   : > { %3580 = vmatprep.subr.bf16.mxu0 %v3980_v15  ;;  %v4702_v29 = vadd.s32 80, %v4661_v13  ;;  %v4705_v30 = vadd.s32 88, %v4661_v13  ;;  %v4764_v0 = vadd.s32 96, %v4661_v13  ;;  %v4779_v5 = vadd.s32 104, %v4661_v13 }
 0x188   : > { %vm1018_vm0 = vcmp.eq.s32.totalorder %v4661_v13, %v4686_v23  ;;  %vm1020_vm1 = vcmp.eq.s32.totalorder %v4664_v16, %v4686_v23  ;;  %vm898_vm2 = vcmp.eq.s32.totalorder %v4661_v13, %v4690_v24  ;;  %vm900_vm3 = vcmp.eq.s32.totalorder %v4664_v16, %v4690_v24 }
 0x189   : > { %v3060_v34 = vsel %vm1018_vm0, 1.0, %v4406_v33  ;;  %v3062_v35 = vsel %vm1020_vm1, 1.0, %v4406_v33  ;;  %v3028_v36 = vsel %vm898_vm2, 1.0, %v4406_v33  ;;  %v3030_v37 = vsel %vm900_vm3, 1.0, %v4406_v33  ;;  %3629 = vmatpush3.bf16.msra.mxu1 %v3981_v26 }
 0x18a   : > { %3581 = vmatpush3.bf16.msra.mxu0 %v3980_v15  ;;  %v1114_v38 = vpack.c.bf16 %v3062_v35, %v3060_v34  ;;  %v994_v39 = vpack.c.bf16 %v3030_v37, %v3028_v36  ;;  %vm1022_vm4 = vcmp.eq.s32.totalorder %v4670_v18, %v4686_v23  ;;  %vm1024_vm5 = vcmp.eq.s32.totalorder %v4673_v19, %v4686_v23  ;;  %v3992_v34 = vld [vmem:[#allocation4] sm:$0xff]   ;;  %v4805_v35 = vld [vmem:[#allocation12] sm:$0xff] }
 0x18b   : > { %3582 = vmatprep.subr.bf16.mxu0 %v3982_v31  ;;  %v3064_v41 = vsel %vm1022_vm4, 1.0, %v4406_v33  ;;  %v3066_v42 = vsel %vm1024_vm5, 1.0, %v4406_v33  ;;  %vm902_vm6 = vcmp.eq.s32.totalorder %v4670_v18, %v4690_v24  ;;  %vm904_vm7 = vcmp.eq.s32.totalorder %v4673_v19, %v4690_v24  ;;  %3630 = vmatprep.subr.bf16.mxu1 %v3983_v32  ;;  %v3993_v37 = vld [vmem:[#allocation3] sm:$0xff]  }
 0x18c   : > { %1162 = vxpose.xlu0.c.b16.start [1/8] %v1114_v38, 128  ;;  %1403 = vxpose.xlu1.c.b16.start [1/8] %v994_v39, 128  ;;  %v1116_v44 = vpack.c.bf16 %v3066_v42, %v3064_v41  ;;  %v3032_v45 = vsel %vm902_vm6, 1.0, %v4406_v33  ;;  %v3034_v46 = vsel %vm904_vm7, 1.0, %v4406_v33  ;;  %vm1026_vm8 = vcmp.eq.s32.totalorder %v4676_v20, %v4686_v23 }
 0x18d   : > { %v996_v47 = vpack.c.bf16 %v3034_v46, %v3032_v45  ;;  %vm1028_vm9 = vcmp.eq.s32.totalorder %v4679_v21, %v4686_v23  ;;  %v3068_v48 = vsel %vm1026_vm8, 1.0, %v4406_v33  ;;  %vm906_vm10 = vcmp.eq.s32.totalorder %v4676_v20, %v4690_v24  ;;  %3631 = vmatpush3.bf16.msra.mxu1 %v3983_v32 }
 0x18e   : > { %3583 = vmatpush3.bf16.msra.mxu0 %v3982_v31  ;;  %v3070_v49 = vsel %vm1028_vm9, 1.0, %v4406_v33  ;;  %vm908_vm11 = vcmp.eq.s32.totalorder %v4679_v21, %v4690_v24  ;;  %v3036_v50 = vsel %vm906_vm10, 1.0, %v4406_v33  ;;  %vm1030_vm12 = vcmp.eq.s32.totalorder %v4682_v22, %v4686_v23  ;;  %3632 = vmatprep.subr.bf16.mxu1 %v3985_v43 }
 0x18f   : > { %3584 = vmatprep.subr.bf16.mxu0 %v3984_v40  ;;  %v1118_v53 = vpack.c.bf16 %v3070_v49, %v3068_v48  ;;  %v3038_v54 = vsel %vm908_vm11, 1.0, %v4406_v33  ;;  %vm1032_vm13 = vcmp.eq.s32.totalorder %v4693_v25, %v4686_v23  ;;  %v3072_v55 = vsel %vm1030_vm12, 1.0, %v4406_v33 }
 0x190   : > { %1163 = vxpose.xlu0.c.b16.cont [2/8] %v1116_v44, 128  ;;  %1404 = vxpose.xlu1.c.b16.cont [2/8] %v996_v47, 128  ;;  %v998_v56 = vpack.c.bf16 %v3038_v54, %v3036_v50  ;;  %v3074_v57 = vsel %vm1032_vm13, 1.0, %v4406_v33  ;;  %vm910_vm14 = vcmp.eq.s32.totalorder %v4682_v22, %v4690_v24  ;;  %vm912_vm15 = vcmp.eq.s32.totalorder %v4693_v25, %v4690_v24 }
 0x191   : > { %v3040_v59 = vsel %vm910_vm14, 1.0, %v4406_v33  ;;  %v3042_v60 = vsel %vm912_vm15, 1.0, %v4406_v33  ;;  %vm1034_vm0 = vcmp.eq.s32.totalorder %v4696_v27, %v4686_v23  ;;  %3633 = vmatpush3.bf16.msra.mxu1 %v3985_v43  ;;  %vm1036_vm1 = vcmp.eq.s32.totalorder %v4699_v28, %v4686_v23 }
 0x192   : > { %3585 = vmatpush3.bf16.msra.mxu0 %v3984_v40  ;;  %vm914_vm2 = vcmp.eq.s32.totalorder %v4696_v27, %v4690_v24  ;;  %3634 = vmatprep.subr.bf16.mxu1 %v3987_v52  ;;  %v1120_v62 = vpack.c.bf16 %v3074_v57, %v3072_v55  ;;  %v1000_v63 = vpack.c.bf16 %v3042_v60, %v3040_v59  ;;  %v3076_v1 = vsel %vm1034_vm0, 1.0, %v4406_v33 }
 0x193   : > { %3586 = vmatprep.subr.bf16.mxu0 %v3986_v51  ;;  %vm916_vm3 = vcmp.eq.s32.totalorder %v4699_v28, %v4690_v24  ;;  %v3078_v2 = vsel %vm1036_vm1, 1.0, %v4406_v33  ;;  %vm1038_vm4 = vcmp.eq.s32.totalorder %v4702_v29, %v4686_v23  ;;  %vm1040_vm5 = vcmp.eq.s32.totalorder %v4705_v30, %v4686_v23 }
 0x194   : > { %1164 = vxpose.xlu0.c.b16.cont [3/8] %v1118_v53, 128  ;;  %1405 = vxpose.xlu1.c.b16.cont [3/8] %v998_v56, 128  ;;  %v3044_v3 = vsel %vm914_vm2, 1.0, %v4406_v33  ;;  %v3046_v4 = vsel %vm916_vm3, 1.0, %v4406_v33  ;;  %vm918_vm6 = vcmp.eq.s32.totalorder %v4702_v29, %v4690_v24  ;;  %vm920_vm7 = vcmp.eq.s32.totalorder %v4705_v30, %v4690_v24 }
 0x195   : > { %3635 = vmatpush3.bf16.msra.mxu1 %v3987_v52  ;;  %v1122_v8 = vpack.c.bf16 %v3078_v2, %v3076_v1  ;;  %v3080_v9 = vsel %vm1038_vm4, 1.0, %v4406_v33  ;;  %v3082_v12 = vsel %vm1040_vm5, 1.0, %v4406_v33  ;;  %vm1042_vm8 = vcmp.eq.s32.totalorder %v4764_v0, %v4686_v23 }
 0x196   : > { %3587 = vmatpush3.bf16.msra.mxu0 %v3986_v51  ;;  %3636 = vmatprep.subr.bf16.mxu1 %v3989_v61  ;;  %v1002_v14 = vpack.c.bf16 %v3046_v4, %v3044_v3  ;;  %v3048_v15 = vsel %vm918_vm6, 1.0, %v4406_v33  ;;  %v3050_v26 = vsel %vm920_vm7, 1.0, %v4406_v33  ;;  %vm922_vm9 = vcmp.eq.s32.totalorder %v4764_v0, %v4690_v24 }
 0x197   : > { %3588 = vmatprep.subr.bf16.mxu0 %v3988_v58  ;;  %vm1044_vm10 = vcmp.eq.s32.totalorder %v4779_v5, %v4686_v23  ;;  %vm924_vm11 = vcmp.eq.s32.totalorder %v4779_v5, %v4690_v24  ;;  %v4800_v31 = vadd.s32 112, %v4661_v13  ;;  %v4803_v32 = vadd.s32 120, %v4661_v13 }
 0x198   : > { %1165 = vxpose.xlu0.c.b16.cont [4/8] %v1120_v62, 128  ;;  %1406 = vxpose.xlu1.c.b16.cont [4/8] %v1000_v63, 128  ;;  %v3084_v36 = vsel %vm1042_vm8, 1.0, %v4406_v33  ;;  %v3052_v38 = vsel %vm922_vm9, 1.0, %v4406_v33  ;;  %v896_v39 = vsub.s32 1, %v4661_v13  ;;  %v1124_v40 = vpack.c.bf16 %v3082_v12, %v3080_v9  ;;  %v4871_v62 = vld [vmem:[#allocation11 + $0xb8] sm:$0xff]  }
 0x199   : > { %3637 = vmatpush3.bf16.msra.mxu1 %v3989_v61  ;;  %v1004_v41 = vpack.c.bf16 %v3050_v26, %v3048_v15  ;;  %v3086_v42 = vsel %vm1044_vm10, 1.0, %v4406_v33  ;;  %v3054_v43 = vsel %vm924_vm11, 1.0, %v4406_v33  ;;  %vm1046_vm12 = vcmp.eq.s32.totalorder %v4800_v31, %v4686_v23 }
 0x19a   : > { %3589 = vmatpush3.bf16.msra.mxu0 %v3988_v58  ;;  %3638 = vmatprep.subr.bf16.mxu1 %v3991_v7  ;;  %vm1048_vm13 = vcmp.eq.s32.totalorder %v4803_v32, %v4686_v23  ;;  %vm926_vm14 = vcmp.eq.s32.totalorder %v4800_v31, %v4690_v24  ;;  %v4825_v44 = vrot.slane %v4805_v35, %v896_v39  ;;  %v3088_v49 = vsel %vm1046_vm12, 1.0, %v4406_v33 }
 0x19b   : > { %3590 = vmatprep.subr.bf16.mxu0 %v3990_v6  ;;  %vm928_vm15 = vcmp.eq.s32.totalorder %v4803_v32, %v4690_v24  ;;  %v4830_v45 = vrot.slane %v4655_v10, %v896_v39  ;;  %v4833_v46 = vrot.slane %v4659_v11, %v896_v39  ;;  %v1126_v47 = vpack.c.bf16 %v3086_v42, %v3084_v36 }
 0x19c   : > { %1166 = vxpose.xlu0.c.b16.cont [5/8] %v1122_v8, 128  ;;  %1407 = vxpose.xlu1.c.b16.cont [5/8] %v1002_v14, 128  ;;  %v1006_v48 = vpack.c.bf16 %v3054_v43, %v3052_v38  ;;  %v3090_v50 = vsel %vm1048_vm13, 1.0, %v4406_v33  ;;  %v3056_v51 = vsel %vm926_vm14, 1.0, %v4406_v33  ;;  %v3058_v24 = vsel %vm928_vm15, 1.0, %v4406_v33 }
 0x19d   : > { %3639 = vmatpush3.bf16.msra.mxu1 %v3991_v7  ;;  %vm1019_vm0 = vcmp.eq.s32.totalorder %v4661_v13, %v4830_v45  ;;  %vm1021_vm1 = vcmp.eq.s32.totalorder %v4664_v16, %v4830_v45  ;;  %vm899_vm2 = vcmp.eq.s32.totalorder %v4661_v13, %v4833_v46  ;;  %vm901_vm3 = vcmp.eq.s32.totalorder %v4664_v16, %v4833_v46 }
 0x19e   : > { %3591 = vmatpush3.bf16.msra.mxu0 %v3990_v6  ;;  %3640 = vmatprep.subr.bf16.mxu1 %v3993_v37  ;;  %v1128_v10 = vpack.c.bf16 %v3090_v50, %v3088_v49  ;;  %v1008_v11 = vpack.c.bf16 %v3058_v24, %v3056_v51  ;;  %v3061_v52 = vsel %vm1019_vm0, 1.0, %v4406_v33  ;;  %v3063_v53 = vsel %vm1021_vm1, 1.0, %v4406_v33 }
 0x19f   : > { %3592 = vmatprep.subr.bf16.mxu0 %v3992_v34  ;;  %v3029_v54 = vsel %vm899_vm2, 1.0, %v4406_v33  ;;  %v3031_v55 = vsel %vm901_vm3, 1.0, %v4406_v33  ;;  %vm1023_vm4 = vcmp.eq.s32.totalorder %v4670_v18, %v4830_v45  ;;  %vm1025_vm5 = vcmp.eq.s32.totalorder %v4673_v19, %v4830_v45 }
 0x1a0   : > { %1167 = vxpose.xlu0.c.b16.cont [6/8] %v1124_v40, 128  ;;  %1408 = vxpose.xlu1.c.b16.cont [6/8] %v1004_v41, 128  ;;  %vm903_vm6 = vcmp.eq.s32.totalorder %v4670_v18, %v4833_v46  ;;  %vm905_vm7 = vcmp.eq.s32.totalorder %v4673_v19, %v4833_v46  ;;  %v1115_v56 = vpack.c.bf16 %v3063_v53, %v3061_v52  ;;  %v3065_v58 = vsel %vm1023_vm4, 1.0, %v4406_v33 }
 0x1a1   : > { %3641 = vmatpush3.bf16.msra.mxu1 %v3993_v37  ;;  %v995_v57 = vpack.c.bf16 %v3031_v55, %v3029_v54  ;;  %v3067_v59 = vsel %vm1025_vm5, 1.0, %v4406_v33  ;;  %v3033_v60 = vsel %vm903_vm6, 1.0, %v4406_v33  ;;  %v3035_v61 = vsel %vm905_vm7, 1.0, %v4406_v33 }
 0x1a2   : > { %3593 = vmatpush3.bf16.msra.mxu0 %v3992_v34  ;;  %vm1027_vm8 = vcmp.eq.s32.totalorder %v4676_v20, %v4830_v45  ;;  %vm1029_vm9 = vcmp.eq.s32.totalorder %v4679_v21, %v4830_v45  ;;  %vm907_vm10 = vcmp.eq.s32.totalorder %v4676_v20, %v4833_v46  ;;  %vm909_vm11 = vcmp.eq.s32.totalorder %v4679_v21, %v4833_v46 }
 0x1a3   : > { %v1117_v63 = vpack.c.bf16 %v3067_v59, %v3065_v58  ;;  %v997_v1 = vpack.c.bf16 %v3035_v61, %v3033_v60  ;;  %v3069_v2 = vsel %vm1027_vm8, 1.0, %v4406_v33  ;;  %v3071_v3 = vsel %vm1029_vm9, 1.0, %v4406_v33  ;;  %3674 = vmatprep.subr.bf16.mxu0 %v4871_v62  ;;  %v3997_v58 = vld [vmem:[#allocation11 + $0xa0] sm:$0xff]  }
 0x1a4   : > { %1168 = vxpose.xlu0.c.b16.cont [7/8] %v1126_v47, 128  ;;  %1409 = vxpose.xlu1.c.b16.cont [7/8] %v1006_v48, 128  ;;  %v3037_v4 = vsel %vm907_vm10, 1.0, %v4406_v33  ;;  %v3039_v6 = vsel %vm909_vm11, 1.0, %v4406_v33  ;;  %vm1031_vm12 = vcmp.eq.s32.totalorder %v4682_v22, %v4830_v45  ;;  %vm1033_vm13 = vcmp.eq.s32.totalorder %v4693_v25, %v4830_v45 }
 0x1a5   : > { %vm911_vm14 = vcmp.eq.s32.totalorder %v4682_v22, %v4833_v46  ;;  %vm913_vm15 = vcmp.eq.s32.totalorder %v4693_v25, %v4833_v46  ;;  %v1119_v7 = vpack.c.bf16 %v3071_v3, %v3069_v2  ;;  %v999_v8 = vpack.c.bf16 %v3039_v6, %v3037_v4 }
 0x1a6   : > { %v3073_v9 = vsel %vm1031_vm12, 1.0, %v4406_v33  ;;  %v3075_v12 = vsel %vm1033_vm13, 1.0, %v4406_v33  ;;  %v3041_v14 = vsel %vm911_vm14, 1.0, %v4406_v33  ;;  %v3043_v15 = vsel %vm913_vm15, 1.0, %v4406_v33 }
 0x1a7   : > { %vm1035_vm0 = vcmp.eq.s32.totalorder %v4696_v27, %v4830_v45  ;;  %vm1037_vm1 = vcmp.eq.s32.totalorder %v4699_v28, %v4830_v45  ;;  %vm915_vm2 = vcmp.eq.s32.totalorder %v4696_v27, %v4833_v46  ;;  %vm917_vm3 = vcmp.eq.s32.totalorder %v4699_v28, %v4833_v46 }
 0x1a8   : > { %1169 = vxpose.xlu0.c.b16.end [8/8] %v1128_v10, 128  ;;  %1410 = vxpose.xlu1.c.b16.end [8/8] %v1008_v11, 128  ;;  %v1121_v26 = vpack.c.bf16 %v3075_v12, %v3073_v9  ;;  %v1001_v34 = vpack.c.bf16 %v3043_v15, %v3041_v14  ;;  %v3077_v36 = vsel %vm1035_vm0, 1.0, %v4406_v33  ;;  %v3079_v37 = vsel %vm1037_vm1, 1.0, %v4406_v33 }
 0x1a9   : > { %v3045_v38 = vsel %vm915_vm2, 1.0, %v4406_v33  ;;  %v3047_v39 = vsel %vm917_vm3, 1.0, %v4406_v33  ;;  %vm1039_vm4 = vcmp.eq.s32.totalorder %v4702_v29, %v4830_v45  ;;  %vm1041_vm5 = vcmp.eq.s32.totalorder %v4705_v30, %v4830_v45 }
 0x1aa   : > { %vm919_vm6 = vcmp.eq.s32.totalorder %v4702_v29, %v4833_v46  ;;  %vm921_vm7 = vcmp.eq.s32.totalorder %v4705_v30, %v4833_v46  ;;  %v1123_v27 = vpack.c.bf16 %v3079_v37, %v3077_v36  ;;  %v1003_v28 = vpack.c.bf16 %v3047_v39, %v3045_v38 }
 0x1ab   : > { %v3081_v40 = vsel %vm1039_vm4, 1.0, %v4406_v33  ;;  %v3083_v41 = vsel %vm1041_vm5, 1.0, %v4406_v33  ;;  %v3049_v42 = vsel %vm919_vm6, 1.0, %v4406_v33  ;;  %v3051_v43 = vsel %vm921_vm7, 1.0, %v4406_v33 }
 0x1ac   : > { %1178 = vxpose.xlu0.c.b16.start [1/8] %v1115_v56, 128  ;;  %1419 = vxpose.xlu1.c.b16.start [1/8] %v995_v57, 128  ;;  %vm1043_vm8 = vcmp.eq.s32.totalorder %v4764_v0, %v4830_v45  ;;  %vm1045_vm9 = vcmp.eq.s32.totalorder %v4779_v5, %v4830_v45  ;;  %vm923_vm10 = vcmp.eq.s32.totalorder %v4764_v0, %v4833_v46  ;;  %v3996_v56 = vld [vmem:[#allocation11 + $0xa8] sm:$0xff]  }
 0x1ad   : > { %vm925_vm11 = vcmp.eq.s32.totalorder %v4779_v5, %v4833_v46  ;;  %v1125_v29 = vpack.c.bf16 %v3083_v41, %v3081_v40  ;;  %v1005_v30 = vpack.c.bf16 %v3051_v43, %v3049_v42  ;;  %v3085_v47 = vsel %vm1043_vm8, 1.0, %v4406_v33  ;;  %v3998_v42 = vld [vmem:[#allocation11 + $0x98] sm:$0xff]   ;;  %v3999_v43 = vld [vmem:[#allocation11 + $0x90] sm:$0xff]  }
 0x1ae   : > { %v3087_v48 = vsel %vm1045_vm9, 1.0, %v4406_v33  ;;  %v3053_v49 = vsel %vm923_vm10, 1.0, %v4406_v33  ;;  %v3055_v50 = vsel %vm925_vm11, 1.0, %v4406_v33  ;;  %vm1047_vm12 = vcmp.eq.s32.totalorder %v4800_v31, %v4830_v45 }
 0x1af   : > { %vm1049_vm13 = vcmp.eq.s32.totalorder %v4803_v32, %v4830_v45  ;;  %vm927_vm14 = vcmp.eq.s32.totalorder %v4800_v31, %v4833_v46  ;;  %vm929_vm15 = vcmp.eq.s32.totalorder %v4803_v32, %v4833_v46  ;;  %v1127_v0 = vpack.c.bf16 %v3087_v48, %v3085_v47  ;;  %v3995_v46 = vld [vmem:[#allocation11 + $0xb0] sm:$0xff]  }
 0x1b0   : > { %1179 = vxpose.xlu0.c.b16.cont [2/8] %v1117_v63, 128  ;;  %1420 = vxpose.xlu1.c.b16.cont [2/8] %v997_v1, 128  ;;  %v1007_v5 = vpack.c.bf16 %v3055_v50, %v3053_v49  ;;  %v3089_v51 = vsel %vm1047_vm12, 1.0, %v4406_v33  ;;  %v3091_v24 = vsel %vm1049_vm13, 1.0, %v4406_v33  ;;  %v3057_v10 = vsel %vm927_vm14, 1.0, %v4406_v33 }
 0x1b1   : > { %v3059_v11 = vsel %vm929_vm15, 1.0, %v4406_v33  ;;  %v1129_v52 = vpack.c.bf16 %v3091_v24, %v3089_v51 }
 0x1b2   : > { %v1009_v53 = vpack.c.bf16 %v3059_v11, %v3057_v10 }
 0x1b4   : > { %1180 = vxpose.xlu0.c.b16.cont [3/8] %v1119_v7, 128  ;;  %1421 = vxpose.xlu1.c.b16.cont [3/8] %v999_v8, 128 }
 0x1b8   : > { %1181 = vxpose.xlu0.c.b16.cont [4/8] %v1121_v26, 128  ;;  %1422 = vxpose.xlu1.c.b16.cont [4/8] %v1001_v34, 128 }
 0x1bc   : > { %1182 = vxpose.xlu0.c.b16.cont [5/8] %v1123_v27, 128  ;;  %1423 = vxpose.xlu1.c.b16.cont [5/8] %v1003_v28, 128 }
 0x1c0   : > { %1183 = vxpose.xlu0.c.b16.cont [6/8] %v1125_v29, 128  ;;  %1424 = vxpose.xlu1.c.b16.cont [6/8] %v1005_v30, 128  ;;  %v4000_v29 = vld [vmem:[#allocation11 + $0x88] sm:$0xff]   ;;  %v4001_v30 = vld [vmem:[#allocation11 + $0x80] sm:$0xff]  }
 0x1c4   : > { %1184 = vxpose.xlu0.c.b16.cont [7/8] %v1127_v0, 128  ;;  %1425 = vxpose.xlu1.c.b16.cont [7/8] %v1007_v5, 128  ;;  %v4941_v5 = vrot.slane %v4805_v35, %v4667_v17 }
 0x1c8   : > { %1185 = vxpose.xlu0.c.b16.end [8/8] %v1129_v52, 128  ;;  %1426 = vxpose.xlu1.c.b16.end [8/8] %v1009_v53, 128 }
 0x1ee   : > { %v1170_v31 = vpop.trf.xlu0  ;;  %v1411_v32 = vpop.trf.xlu1 }
 0x1ef   : > { %3594 = vmatprep.mubr.bf16.mxu0 %v1170_v31  ;;  %3642 = vmatprep.mubr.bf16.mxu1 %v1411_v32 }
 0x1f2   : > { %v1171_v54 = vpop.trf.xlu0  ;;  %v1412_v55 = vpop.trf.xlu1 }
 0x1f3   : > { %3595 = vmatmul.mubr.bf16.vlgmr.msra.gmra.mxu0 %v1171_v54  ;;  %3643 = vmatmul.mubr.bf16.vlgmr.msra.gmra.mxu1 %v1412_v55 }
 0x1f4   : > { %3675 = vmatpush3.bf16.msra.mxu0 %v4871_v62 }
 0x1f5   : > { %3676 = vmatprep.subr.bf16.mxu0 %v3995_v46 }
 0x1f6   : > { %v1172_v33 = vpop.trf.xlu0  ;;  %v1413_v57 = vpop.trf.xlu1 }
 0x1f7   : > { %3598 = vmatprep.mubr.bf16.mxu0 %v1172_v33  ;;  %3646 = vmatprep.mubr.bf16.mxu1 %v1413_v57 }
 0x1f8   : > { %3677 = vmatpush3.bf16.msra.mxu0 %v3995_v46 }
 0x1f9   : > { %3678 = vmatprep.subr.bf16.mxu0 %v3996_v56 }
 0x1fa   : > { %v1173_v59 = vpop.trf.xlu0  ;;  %v1414_v60 = vpop.trf.xlu1 }
 0x1fb   : > { %3599 = vmatmul.mubr.bf16.gmra.mxu0 %v1173_v59  ;;  %3647 = vmatmul.mubr.bf16.gmra.mxu1 %v1414_v60 }
 0x1fc   : > { %3679 = vmatpush3.bf16.msra.mxu0 %v3996_v56 }
 0x1fd   : > { %3680 = vmatprep.subr.bf16.mxu0 %v3997_v58 }
 0x1fe   : > { %v1174_v61 = vpop.trf.xlu0  ;;  %v1415_v63 = vpop.trf.xlu1 }
 0x1ff   : > { %3602 = vmatprep.mubr.bf16.mxu0 %v1174_v61  ;;  %3650 = vmatprep.mubr.bf16.mxu1 %v1415_v63 }
 0x200   : > { %3681 = vmatpush3.bf16.msra.mxu0 %v3997_v58 }
 0x201   : > { %3682 = vmatprep.subr.bf16.mxu0 %v3998_v42 }
 0x202   : > { %v1175_v62 = vpop.trf.xlu0  ;;  %v1416_v1 = vpop.trf.xlu1 }
 0x203   : > { %3603 = vmatmul.mubr.bf16.gmra.mxu0 %v1175_v62  ;;  %3651 = vmatmul.mubr.bf16.gmra.mxu1 %v1416_v1 }
 0x204   : > { %3683 = vmatpush3.bf16.msra.mxu0 %v3998_v42 }
 0x205   : > { %3684 = vmatprep.subr.bf16.mxu0 %v3999_v43 }
 0x206   : > { %v1176_v2 = vpop.trf.xlu0  ;;  %v1417_v3 = vpop.trf.xlu1 }
 0x207   : > { %3606 = vmatprep.mubr.bf16.mxu0 %v1176_v2  ;;  %3654 = vmatprep.mubr.bf16.mxu1 %v1417_v3 }
 0x208   : > { %3685 = vmatpush3.bf16.msra.mxu0 %v3999_v43 }
 0x209   : > { %3686 = vmatprep.subr.bf16.mxu0 %v4000_v29 }
 0x20a   : > { %v1177_v4 = vpop.trf.xlu0  ;;  %v1418_v6 = vpop.trf.xlu1 }
 0x20b   : > { %3607 = vmatmul.mubr.bf16.gmra.mxu0 %v1177_v4  ;;  %3655 = vmatmul.mubr.bf16.gmra.mxu1 %v1418_v6 }
 0x20c   : > { %3687 = vmatpush3.bf16.msra.mxu0 %v4000_v29 }
 0x20d   : > { %3688 = vmatprep.subr.bf16.mxu0 %v4001_v30 }
 0x20e   : > { %v1186_v7 = vpop.trf.xlu0  ;;  %v1427_v8 = vpop.trf.xlu1 }
 0x20f   : > { %3610 = vmatprep.mubr.bf16.mxu0 %v1186_v7  ;;  %3658 = vmatprep.mubr.bf16.mxu1 %v1427_v8 }
 0x210   : > { %3689 = vmatpush3.bf16.msra.mxu0 %v4001_v30 }
 0x212   : > { %v1187_v9 = vpop.trf.xlu0  ;;  %v1428_v12 = vpop.trf.xlu1 }
 0x213   : > { %3611 = vmatmul.mubr.bf16.gmra.mxu0 %v1187_v9  ;;  %3659 = vmatmul.mubr.bf16.gmra.mxu1 %v1428_v12 }
 0x216   : > { %v1188_v14 = vpop.trf.xlu0  ;;  %v1429_v15 = vpop.trf.xlu1 }
 0x217   : > { %3614 = vmatprep.mubr.bf16.mxu0 %v1188_v14  ;;  %3662 = vmatprep.mubr.bf16.mxu1 %v1429_v15 }
 0x21a   : > { %v1189_v26 = vpop.trf.xlu0  ;;  %v1430_v34 = vpop.trf.xlu1 }
 0x21b   : > { %3615 = vmatmul.mubr.bf16.gmra.mxu0 %v1189_v26  ;;  %3663 = vmatmul.mubr.bf16.gmra.mxu1 %v1430_v34 }
 0x21e   : > { %v1190_v36 = vpop.trf.xlu0  ;;  %v1431_v37 = vpop.trf.xlu1 }
 0x21f   : > { %3618 = vmatprep.mubr.bf16.mxu0 %v1190_v36  ;;  %3666 = vmatprep.mubr.bf16.mxu1 %v1431_v37 }
 0x222   : > { %v1191_v38 = vpop.trf.xlu0  ;;  %v1432_v39 = vpop.trf.xlu1 }
 0x223   : > { %3619 = vmatmul.mubr.bf16.gmra.mxu0 %v1191_v38  ;;  %3667 = vmatmul.mubr.bf16.gmra.mxu1 %v1432_v39 }
 0x226   : > { %v1192_v27 = vpop.trf.xlu0  ;;  %v1433_v28 = vpop.trf.xlu1 }
 0x227   : > { %3622 = vmatprep.mubr.bf16.mxu0 %v1192_v27  ;;  %3670 = vmatprep.mubr.bf16.mxu1 %v1433_v28 }
 0x22a   : > { %v1193_v40 = vpop.trf.xlu0  ;;  %v1434_v41 = vpop.trf.xlu1 }
 0x22b   : > { %3623 = vmatmul.mubr.bf16.gmra.mxu0 %v1193_v40  ;;  %3671 = vmatmul.mubr.bf16.gmra.mxu1 %v1434_v41 }
 0x2b3   : > { %v3596_v47 = vpop.f32.mrf.mxu0  ;;  %v3644_v48 = vpop.f32.mrf.mxu1 }
 0x2b4   : > { %v1526_v51 = vadd.f32 %v3644_v48, %v3596_v47 }
 0x2b5   : > { %v1276_v49 = vpop.f32.mrf.mxu0  ;;  %v1517_v50 = vpop.f32.mrf.mxu1 }
 0x2b6   : > { %v1518_v0 = vadd.f32 %v1517_v50, %v1276_v49  ;;  %v1650_v54 = vadd.f32 %v4941_v5, %v1526_v51 }
 0x2b7   : > { %v3597_v24 = vpop.f32.mrf.mxu0  ;;  %v3645_v10 = vpop.f32.mrf.mxu1 }
 0x2b8   : > { %v1529_v11 = vadd.f32 %v3645_v10, %v3597_v24  ;;  %v1648_v31 = vadd.f32 %v4941_v5, %v1518_v0  ;;  %v1682_v63 = vmax.f32 %v1650_v54, 0.0 }
 0x2b9   : > { %v1279_v52 = vpop.f32.mrf.mxu0  ;;  %v1520_v53 = vpop.f32.mrf.mxu1 }
 0x2ba   : > { %v1651_v32 = vadd.f32 %v4941_v5, %v1529_v11  ;;  %v1521_v46 = vadd.f32 %v1520_v53, %v1279_v52  ;;  %v1680_v59 = vmax.f32 %v1648_v31, 0.0 }
 0x2bb   : > { %v3600_v55 = vpop.f32.mrf.mxu0  ;;  %v3648_v56 = vpop.f32.mrf.mxu1 }
 0x2bc   : > { %v1649_v33 = vadd.f32 %v4941_v5, %v1521_v46  ;;  %v1683_v57 = vmax.f32 %v1651_v32, 0.0  ;;  %v1542_v62 = vadd.f32 %v3648_v56, %v3600_v55 }
 0x2bd   : > { %v1292_v17 = vpop.f32.mrf.mxu0  ;;  %v1533_v58 = vpop.f32.mrf.mxu1 }
 0x2be   : > { %v1681_v60 = vmax.f32 %v1649_v33, 0.0  ;;  %v1534_v61 = vadd.f32 %v1533_v58, %v1292_v17  ;;  %v1713_v6 = vpack.c.bf16 %v1683_v57, %v1682_v63  ;;  %v1654_v15 = vadd.f32 %v4941_v5, %v1542_v62 }
 0x2bf   : > { %v3601_v1 = vpop.f32.mrf.mxu0  ;;  %v3649_v2 = vpop.f32.mrf.mxu1 }
 0x2c0   : > { %v1545_v3 = vadd.f32 %v3649_v2, %v3601_v1  ;;  %v1712_v4 = vpack.c.bf16 %v1681_v60, %v1680_v59  ;;  %v1652_v9 = vadd.f32 %v4941_v5, %v1534_v61  ;;  %v1686_v41 = vmax.f32 %v1654_v15, 0.0 }
 0x2c1   : > { %v1295_v7 = vpop.f32.mrf.mxu0  ;;  %v1536_v8 = vpop.f32.mrf.mxu1 }
 0x2c2   : > { %v1655_v12 = vadd.f32 %v4941_v5, %v1545_v3  ;;  %v1537_v14 = vadd.f32 %v1536_v8, %v1295_v7  ;;  %3690 = vmatprep.mubr.bf16.mxu0 %v1712_v4  ;;  %v1684_v27 = vmax.f32 %v1652_v9, 0.0 }
 0x2c3   : > { %v3604_v26 = vpop.f32.mrf.mxu0  ;;  %v3652_v34 = vpop.f32.mrf.mxu1  ;;  %3691 = vmatmul.mubr.bf16.vlgmr.msra.gmra.mxu0 %v1713_v6 }
 0x2c4   : > { %v1653_v36 = vadd.f32 %v4941_v5, %v1537_v14  ;;  %v1687_v37 = vmax.f32 %v1655_v12, 0.0  ;;  %v1558_v42 = vadd.f32 %v3652_v34, %v3604_v26 }
 0x2c5   : > { %v1308_v38 = vpop.f32.mrf.mxu0  ;;  %v1549_v39 = vpop.f32.mrf.mxu1 }
 0x2c6   : > { %v1685_v28 = vmax.f32 %v1653_v36, 0.0  ;;  %v1550_v40 = vadd.f32 %v1549_v39, %v1308_v38  ;;  %v1715_v50 = vpack.c.bf16 %v1687_v37, %v1686_v41  ;;  %v1658_v10 = vadd.f32 %v4941_v5, %v1558_v42 }
 0x2c7   : > { %v3605_v43 = vpop.f32.mrf.mxu0  ;;  %v3653_v29 = vpop.f32.mrf.mxu1 }
 0x2c8   : > { %v1561_v30 = vadd.f32 %v3653_v29, %v3605_v43  ;;  %v1714_v47 = vpack.c.bf16 %v1685_v28, %v1684_v27  ;;  %v1656_v0 = vadd.f32 %v4941_v5, %v1550_v40  ;;  %v1690_v33 = vmax.f32 %v1658_v10, 0.0 }
 0x2c9   : > { %v1311_v48 = vpop.f32.mrf.mxu0  ;;  %v1552_v49 = vpop.f32.mrf.mxu1 }
 0x2ca   : > { %v1659_v51 = vadd.f32 %v4941_v5, %v1561_v30  ;;  %v1553_v24 = vadd.f32 %v1552_v49, %v1311_v48  ;;  %3694 = vmatprep.mubr.bf16.mxu0 %v1714_v47  ;;  %v1688_v54 = vmax.f32 %v1656_v0, 0.0 }
 0x2cb   : > { %v3608_v11 = vpop.f32.mrf.mxu0  ;;  %v3656_v52 = vpop.f32.mrf.mxu1  ;;  %3695 = vmatmul.mubr.bf16.gmra.mxu0 %v1715_v50 }
 0x2cc   : > { %v1657_v53 = vadd.f32 %v4941_v5, %v1553_v24  ;;  %v1691_v31 = vmax.f32 %v1659_v51, 0.0  ;;  %v1574_v57 = vadd.f32 %v3656_v52, %v3608_v11 }
 0x2cd   : > { %v1324_v32 = vpop.f32.mrf.mxu0  ;;  %v1565_v46 = vpop.f32.mrf.mxu1 }
 0x2ce   : > { %v1689_v55 = vmax.f32 %v1657_v53, 0.0  ;;  %v1566_v56 = vadd.f32 %v1565_v46, %v1324_v32  ;;  %v1717_v62 = vpack.c.bf16 %v1691_v31, %v1690_v33  ;;  %v1662_v4 = vadd.f32 %v4941_v5, %v1574_v57 }
 0x2cf   : > { %v3609_v17 = vpop.f32.mrf.mxu0  ;;  %v3657_v58 = vpop.f32.mrf.mxu1 }
 0x2d0   : > { %v1577_v59 = vadd.f32 %v3657_v58, %v3609_v17  ;;  %v1716_v60 = vpack.c.bf16 %v1689_v55, %v1688_v54  ;;  %v1660_v1 = vadd.f32 %v4941_v5, %v1566_v56  ;;  %v1694_v36 = vmax.f32 %v1662_v4, 0.0 }
 0x2d1   : > { %v1327_v61 = vpop.f32.mrf.mxu0  ;;  %v1568_v63 = vpop.f32.mrf.mxu1 }
 0x2d2   : > { %v1663_v2 = vadd.f32 %v4941_v5, %v1577_v59  ;;  %v1569_v3 = vadd.f32 %v1568_v63, %v1327_v61  ;;  %3698 = vmatprep.mubr.bf16.mxu0 %v1716_v60  ;;  %v1692_v15 = vmax.f32 %v1660_v1, 0.0 }
 0x2d3   : > { %v3612_v6 = vpop.f32.mrf.mxu0  ;;  %v3660_v7 = vpop.f32.mrf.mxu1  ;;  %3699 = vmatmul.mubr.bf16.gmra.mxu0 %v1717_v62 }
 0x2d4   : > { %v1661_v8 = vadd.f32 %v4941_v5, %v1569_v3  ;;  %v1695_v9 = vmax.f32 %v1663_v2, 0.0  ;;  %v1590_v37 = vadd.f32 %v3660_v7, %v3612_v6 }
 0x2d5   : > { %v1340_v12 = vpop.f32.mrf.mxu0  ;;  %v1581_v14 = vpop.f32.mrf.mxu1 }
 0x2d6   : > { %v1693_v26 = vmax.f32 %v1661_v8, 0.0  ;;  %v1582_v34 = vadd.f32 %v1581_v14, %v1340_v12  ;;  %v1719_v42 = vpack.c.bf16 %v1695_v9, %v1694_v36  ;;  %v1666_v47 = vadd.f32 %v4941_v5, %v1590_v37 }
 0x2d7   : > { %v3613_v38 = vpop.f32.mrf.mxu0  ;;  %v3661_v39 = vpop.f32.mrf.mxu1 }
 0x2d8   : > { %v1593_v27 = vadd.f32 %v3661_v39, %v3613_v38  ;;  %v1718_v28 = vpack.c.bf16 %v1693_v26, %v1692_v15  ;;  %v1664_v43 = vadd.f32 %v4941_v5, %v1582_v34  ;;  %v1698_v53 = vmax.f32 %v1666_v47, 0.0 }
 0x2d9   : > { %v1343_v40 = vpop.f32.mrf.mxu0  ;;  %v1584_v41 = vpop.f32.mrf.mxu1 }
 0x2da   : > { %v1667_v29 = vadd.f32 %v4941_v5, %v1593_v27  ;;  %v1585_v30 = vadd.f32 %v1584_v41, %v1343_v40  ;;  %3702 = vmatprep.mubr.bf16.mxu0 %v1718_v28  ;;  %v1696_v10 = vmax.f32 %v1664_v43, 0.0 }
 0x2db   : > { %v3616_v48 = vpop.f32.mrf.mxu0  ;;  %v3664_v49 = vpop.f32.mrf.mxu1  ;;  %3703 = vmatmul.mubr.bf16.gmra.mxu0 %v1719_v42 }
 0x2dc   : > { %v1665_v50 = vadd.f32 %v4941_v5, %v1585_v30  ;;  %v1699_v0 = vmax.f32 %v1667_v29, 0.0  ;;  %v1606_v31 = vadd.f32 %v3664_v49, %v3616_v48 }
 0x2dd   : > { %v1356_v51 = vpop.f32.mrf.mxu0  ;;  %v1597_v24 = vpop.f32.mrf.mxu1 }
 0x2de   : > { %v1697_v11 = vmax.f32 %v1665_v50, 0.0  ;;  %v1598_v52 = vadd.f32 %v1597_v24, %v1356_v51  ;;  %v1721_v57 = vpack.c.bf16 %v1699_v0, %v1698_v53  ;;  %v1670_v60 = vadd.f32 %v4941_v5, %v1606_v31 }
 0x2df   : > { %v3617_v32 = vpop.f32.mrf.mxu0  ;;  %v3665_v46 = vpop.f32.mrf.mxu1 }
 0x2e0   : > { %v1609_v54 = vadd.f32 %v3665_v46, %v3617_v32  ;;  %v1720_v55 = vpack.c.bf16 %v1697_v11, %v1696_v10  ;;  %v1668_v17 = vadd.f32 %v4941_v5, %v1598_v52  ;;  %v1702_v8 = vmax.f32 %v1670_v60, 0.0 }
 0x2e1   : > { %v1359_v56 = vpop.f32.mrf.mxu0  ;;  %v1600_v33 = vpop.f32.mrf.mxu1 }
 0x2e2   : > { %v1671_v58 = vadd.f32 %v4941_v5, %v1609_v54  ;;  %v1601_v59 = vadd.f32 %v1600_v33, %v1359_v56  ;;  %3706 = vmatprep.mubr.bf16.mxu0 %v1720_v55  ;;  %v1700_v4 = vmax.f32 %v1668_v17, 0.0 }
 0x2e3   : > { %v3620_v61 = vpop.f32.mrf.mxu0  ;;  %v3668_v63 = vpop.f32.mrf.mxu1  ;;  %3707 = vmatmul.mubr.bf16.gmra.mxu0 %v1721_v57 }
 0x2e4   : > { %v1669_v62 = vadd.f32 %v4941_v5, %v1601_v59  ;;  %v1703_v1 = vmax.f32 %v1671_v58, 0.0  ;;  %v1622_v9 = vadd.f32 %v3668_v63, %v3620_v61  ;;  %v4978_v61 = vstv %s3116_s12 }
 0x2e5   : > { %v1372_v2 = vpop.f32.mrf.mxu0  ;;  %v1613_v3 = vpop.f32.mrf.mxu1  ;;  %v1992_v63 = vadd.s32 %v4978_v61, %v4661_v13 }
 0x2e6   : > { %v1701_v6 = vmax.f32 %v1669_v62, 0.0  ;;  %v1614_v7 = vadd.f32 %v1613_v3, %v1372_v2  ;;  %v1723_v37 = vpack.c.bf16 %v1703_v1, %v1702_v8  ;;  %v1674_v28 = vadd.f32 %v4941_v5, %v1622_v9 }
 0x2e7   : > { %v3621_v12 = vpop.f32.mrf.mxu0  ;;  %v3669_v14 = vpop.f32.mrf.mxu1  ;;  %v1993_v62 = vadd.s32 %v4978_v61, %v4664_v16  ;;  %vm2000_vm0 = vcmp.eq.s32.totalorder %v1992_v63, %v4686_v23  ;;  %vm2001_vm1 = vcmp.eq.s32.totalorder %v1992_v63, %v4830_v45 }
 0x2e8   : > { %v1625_v15 = vadd.f32 %v3669_v14, %v3621_v12  ;;  %v1722_v26 = vpack.c.bf16 %v1701_v6, %v1700_v4  ;;  %v1672_v38 = vadd.f32 %v4941_v5, %v1614_v7  ;;  %v1706_v50 = vmax.f32 %v1674_v28, 0.0 }
 0x2e9   : > { %v1375_v34 = vpop.f32.mrf.mxu0  ;;  %v1616_v36 = vpop.f32.mrf.mxu1  ;;  %vm2002_vm2 = vcmp.eq.s32.totalorder %v1993_v62, %v4686_v23  ;;  %vm2003_vm3 = vcmp.eq.s32.totalorder %v1993_v62, %v4830_v45 }
 0x2ea   : > { %v1675_v39 = vadd.f32 %v4941_v5, %v1625_v15  ;;  %v1617_v27 = vadd.f32 %v1616_v36, %v1375_v34  ;;  %3710 = vmatprep.mubr.bf16.mxu0 %v1722_v26  ;;  %v1704_v47 = vmax.f32 %v1672_v38, 0.0  ;;  %vm3133_vm4 = vmpackc.low %vm2003_vm3, %vm2001_vm1 }
 0x2eb   : > { %v3624_v40 = vpop.f32.mrf.mxu0  ;;  %v3672_v41 = vpop.f32.mrf.mxu1  ;;  %3711 = vmatmul.mubr.bf16.gmra.mxu0 %v1723_v37  ;;  %vm4989_vm5 = vmpackc.low %vm2002_vm2, %vm2000_vm0 }
 0x2ec   : > { %v1673_v42 = vadd.f32 %v4941_v5, %v1617_v27  ;;  %v1707_v43 = vmax.f32 %v1675_v39, 0.0  ;;  %v1638_v0 = vadd.f32 %v3672_v41, %v3624_v40 }
 0x2ed   : > { %v1388_v29 = vpop.f32.mrf.mxu0  ;;  %v1629_v30 = vpop.f32.mrf.mxu1 }
 0x2ee   : > { %v1705_v48 = vmax.f32 %v1673_v42, 0.0  ;;  %v1630_v49 = vadd.f32 %v1629_v30, %v1388_v29  ;;  %v1725_v31 = vpack.c.bf16 %v1707_v43, %v1706_v50  ;;  %v1678_v55 = vadd.f32 %v4941_v5, %v1638_v0 }
 0x2ef   : > { %v3625_v51 = vpop.f32.mrf.mxu0  ;;  %v3673_v24 = vpop.f32.mrf.mxu1 }
 0x2f0   : > { %v1641_v10 = vadd.f32 %v3673_v24, %v3625_v51  ;;  %v1724_v11 = vpack.c.bf16 %v1705_v48, %v1704_v47  ;;  %v1676_v32 = vadd.f32 %v4941_v5, %v1630_v49  ;;  %v1710_v58 = vmax.f32 %v1678_v55, 0.0 }
 0x2f1   : > { %v1391_v52 = vpop.f32.mrf.mxu0  ;;  %v1632_v53 = vpop.f32.mrf.mxu1 }
 0x2f2   : > { %v1679_v46 = vadd.f32 %v4941_v5, %v1641_v10  ;;  %v1633_v54 = vadd.f32 %v1632_v53, %v1391_v52  ;;  %3714 = vmatprep.mubr.bf16.mxu0 %v1724_v11  ;;  %v1708_v57 = vmax.f32 %v1676_v32, 0.0 }
 0x2f3   : > { %3715 = vmatmul.mubr.bf16.gmra.mxu0 %v1725_v31 }
 0x2f4   : > { %v1677_v56 = vadd.f32 %v4941_v5, %v1633_v54  ;;  %v1711_v33 = vmax.f32 %v1679_v46, 0.0  ;;  %v4407_v5 = vmov 1.0|1.0  }
 0x2f5   : > { %3134 = vmatprep.mubr.msk.bf16.mxu1 %vm3133_vm4, %v4407_v5 }
 0x2f6   : > { %v1709_v17 = vmax.f32 %v1677_v56, 0.0  ;;  %v1727_v60 = vpack.c.bf16 %v1711_v33, %v1710_v58 }
 0x2f8   : > { %v1726_v59 = vpack.c.bf16 %v1709_v17, %v1708_v57 }
 0x2fa   : > { %3718 = vmatprep.mubr.bf16.mxu0 %v1726_v59 }
 0x2fb   : > { %3719 = vmatmul.mubr.bf16.gmra.mxu0 %v1727_v60 }
 0x383   : > { %v3692_v2 = vpop.f32.mrf.mxu0 }
 0x384   : > { %v1840_v3 = vadd.f32 %v3692_v2, %v4825_v44 }
 0x385   : > { %v1831_v16 = vpop.f32.mrf.mxu0 }
 0x386   : > { %v1832_v4 = vadd.f32 %v1831_v16, %v4825_v44  ;;  %4002 = vtanh.f32 %v1840_v3 }
 0x387   : > { %v3693_v6 = vpop.f32.mrf.mxu0 }
 0x388   : > { %v1843_v7 = vadd.f32 %v3693_v6, %v4825_v44 }
 0x389   : > { %v1834_v8 = vpop.f32.mrf.mxu0 }
 0x38a   : > { %4004 = vtanh.f32 %v1843_v7  ;;  %v1835_v9 = vadd.f32 %v1834_v8, %v4825_v44 }
 0x38b   : > { %4006 = vtanh.f32 %v1832_v4  ;;  %v3696_v12 = vpop.f32.mrf.mxu0 }
 0x38c   : > { %4008 = vtanh.f32 %v1835_v9  ;;  %v1856_v14 = vadd.f32 %v3696_v12, %v4825_v44 }
 0x38d   : > { %v1847_v15 = vpop.f32.mrf.mxu0 }
 0x38e   : > { %v1848_v26 = vadd.f32 %v1847_v15, %v4825_v44  ;;  %4010 = vtanh.f32 %v1856_v14 }
 0x38f   : > { %v3697_v34 = vpop.f32.mrf.mxu0 }
 0x390   : > { %v1859_v36 = vadd.f32 %v3697_v34, %v4825_v44 }
 0x391   : > { %v1850_v37 = vpop.f32.mrf.mxu0 }
 0x392   : > { %4012 = vtanh.f32 %v1859_v36  ;;  %v1851_v38 = vadd.f32 %v1850_v37, %v4825_v44 }
 0x393   : > { %4014 = vtanh.f32 %v1848_v26  ;;  %v3700_v39 = vpop.f32.mrf.mxu0  ;;  %v5003_v28 = vpop.eup %4002 }
 0x394   : > { %4016 = vtanh.f32 %v1851_v38  ;;  %v1872_v37 = vadd.f32 %v3700_v39, %v4825_v44 }
 0x395   : > { %v5001_v27 = vpop.f32.mrf.mxu0 }
 0x397   : > { %v5005_v40 = vpop.eup %4004  ;;  %v3701_v41 = vpop.f32.mrf.mxu0 }
 0x398   : > { %v5007_v42 = vpop.eup %4006  ;;  %v2065_v43 = vpack.c.bf16 %v5005_v40, %v5003_v28  ;;  %v1875_v34 = vadd.f32 %v3701_v41, %v4825_v44  ;;  %v1864_v41 = vadd.f32 %v5001_v27, %v4825_v44  ;;  %v2057_v40 = vld [vmem:[%s4639_s15 + $0x8] sm:$0xff] }
 0x399   : > { %v5011_v29 = vpop.eup %4008  ;;  %v1866_v30 = vpop.f32.mrf.mxu0 }
 0x39a   : > { %v2064_v47 = vpack.c.bf16 %v5011_v29, %v5007_v42 }
 0x39b   : > { %v3704_v48 = vpop.f32.mrf.mxu0  ;;  %v5015_v50 = vpop.eup %4010 }
 0x39c   : > { %v1888_v63 = vadd.f32 %v3704_v48, %v4825_v44  ;;  %v1867_v48 = vadd.f32 %v1866_v30, %v4825_v44 }
 0x39d   : > { %v1879_v49 = vpop.f32.mrf.mxu0 }
 0x39e   : > { %4018 = vtanh.f32 %v1888_v63  ;;  %v1880_v15 = vadd.f32 %v1879_v49, %v4825_v44 }
 0x39f   : > { %v5017_v0 = vpop.eup %4012  ;;  %v3705_v51 = vpop.f32.mrf.mxu0 }
 0x3a0   : > { %v5019_v24 = vpop.eup %4014  ;;  %v2067_v10 = vpack.c.bf16 %v5017_v0, %v5015_v50  ;;  %v1891_v2 = vadd.f32 %v3705_v51, %v4825_v44 }
 0x3a1   : > { %v5023_v11 = vpop.eup %4016  ;;  %v1882_v52 = vpop.f32.mrf.mxu0 }
 0x3a2   : > { %v2066_v53 = vpack.c.bf16 %v5023_v11, %v5019_v24  ;;  %4020 = vtanh.f32 %v1891_v2  ;;  %v1883_v8 = vadd.f32 %v1882_v52, %v4825_v44 }
 0x3a3   : > { %v5027_v31 = vpop.f32.mrf.mxu0 }
 0x3a5   : > { %v5029_v32 = vpop.f32.mrf.mxu0 }
 0x3a7   : > { %v3709_v46 = vpop.f32.mrf.mxu0 }
 0x3a8   : > { %v1907_v2 = vadd.f32 %v3709_v46, %v4825_v44 }
 0x3a9   : > { %v5031_v54 = vpop.f32.mrf.mxu0 }
 0x3ab   : > { %v3712_v55 = vpop.f32.mrf.mxu0  ;;  %v4019_v51 = vpop.eup %4018 }
 0x3ac   : > { %v1920_v52 = vadd.f32 %v3712_v55, %v4825_v44 }
 0x3ad   : > { %v1911_v56 = vpop.f32.mrf.mxu0 }
 0x3af   : > { %v3713_v33 = vpop.f32.mrf.mxu0 }
 0x3b0   : > { %v1923_v49 = vadd.f32 %v3713_v33, %v4825_v44  ;;  %v1912_v33 = vadd.f32 %v1911_v56, %v4825_v44 }
 0x3b1   : > { %v1914_v57 = vpop.f32.mrf.mxu0 }
 0x3b3   : > { %v3716_v17 = vpop.f32.mrf.mxu0 }
 0x3b4   : > { %v1936_v26 = vadd.f32 %v3716_v17, %v4825_v44  ;;  %v4021_v17 = vpop.eup %4020 }
 0x3b5   : > { %v1927_v58 = vpop.f32.mrf.mxu0 }
 0x3b6   : > { %v1928_v38 = vadd.f32 %v1927_v58, %v4825_v44  ;;  %v1915_v58 = vadd.f32 %v1914_v57, %v4825_v44  ;;  %v1904_v57 = vadd.f32 %v5027_v31, %v4825_v44 }
 0x3b7   : > { %v3717_v59 = vpop.f32.mrf.mxu0 }
 0x3b8   : > { %v1939_v12 = vadd.f32 %v3717_v59, %v4825_v44 }
 0x3b9   : > { %v1930_v60 = vpop.f32.mrf.mxu0 }
 0x3ba   : > { %v1931_v36 = vadd.f32 %v1930_v60, %v4825_v44 }
 0x3bb   : > { %v3720_v62 = vpop.f32.mrf.mxu0 }
 0x3bc   : > { %v1952_v3 = vadd.f32 %v3720_v62, %v4825_v44  ;;  %v2071_v62 = vpack.c.bf16 %v4021_v17, %v4019_v51 }
 0x3bd   : > { %v1943_v16 = vpop.f32.mrf.mxu0 }
 0x3be   : > { %v1944_v4 = vadd.f32 %v1943_v16, %v4825_v44  ;;  %4022 = vtanh.f32 %v1952_v3 }
 0x3bf   : > { %v3721_v6 = vpop.f32.mrf.mxu0 }
 0x3c0   : > { %v1955_v7 = vadd.f32 %v3721_v6, %v4825_v44 }
 0x3c1   : > { %v1946_v9 = vpop.f32.mrf.mxu0 }
 0x3c2   : > { %4024 = vtanh.f32 %v1955_v7  ;;  %v1947_v14 = vadd.f32 %v1946_v9, %v4825_v44  ;;  %v1899_v7 = vadd.f32 %v5031_v54, %v4825_v44 }
 0x3c3   : > { %4026 = vtanh.f32 %v1944_v4 }
 0x3c4   : > { %4028 = vtanh.f32 %v1947_v14 }
 0x3c5   : > { %4030 = vtanh.f32 %v1883_v8 }
 0x3c6   : > { %4032 = vtanh.f32 %v1939_v12  ;;  %v1896_v12 = vadd.f32 %v5029_v32, %v4825_v44 }
 0x3c7   : > { %4034 = vtanh.f32 %v1880_v15 }
 0x3c8   : > { %4036 = vtanh.f32 %v1936_v26 }
 0x3c9   : > { %4038 = vtanh.f32 %v1875_v34 }
 0x3ca   : > { %4040 = vtanh.f32 %v1931_v36 }
 0x3cb   : > { %4042 = vtanh.f32 %v1872_v37  ;;  %v4023_v39 = vpop.eup %4022 }
 0x3cc   : > { %4044 = vtanh.f32 %v1928_v38 }
 0x3cd   : > { %4046 = vtanh.f32 %v1867_v48 }
 0x3ce   : > { %4048 = vtanh.f32 %v1923_v49 }
 0x3cf   : > { %v4025_v59 = vpop.eup %4024  ;;  %4050 = vtanh.f32 %v1864_v41 }
 0x3d0   : > { %v4027_v30 = vpop.eup %4026  ;;  %4052 = vtanh.f32 %v1920_v52  ;;  %v2079_v60 = vpack.c.bf16 %v4025_v59, %v4023_v39  ;;  %v1994_v39 = vadd.s32 %v4978_v61, %v4670_v18  ;;  %v1996_v18 = vadd.s32 %v4978_v61, %v4676_v20 }
 0x3d1   : > { %v4029_v63 = vpop.eup %4028  ;;  %4054 = vtanh.f32 %v1915_v58  ;;  %v1995_v58 = vadd.s32 %v4978_v61, %v4673_v19  ;;  %v1997_v19 = vadd.s32 %v4978_v61, %v4679_v21  ;;  %v1998_v20 = vadd.s32 %v4978_v61, %v4682_v22 }
 0x3d2   : > { %v4031_v27 = vpop.eup %4030  ;;  %3426 = vmatprep.subr.bf16.mxu1 %v2079_v60  ;;  %v2078_v55 = vpack.c.bf16 %v4029_v63, %v4027_v30  ;;  %4056 = vtanh.f32 %v1912_v33  ;;  %vm2005_vm6 = vcmp.eq.s32.totalorder %v1994_v39, %v4830_v45  ;;  %vm2004_vm9 = vcmp.eq.s32.totalorder %v1994_v39, %v4686_v23  ;;  %v2060_v60 = vld [vmem:[%s4639_s15 + $0x20] sm:$0xff] }
 0x3d3   : > { %v4033_v3 = vpop.eup %4032  ;;  %3427 = vmatpush3.bf16.msra.mxu1 %v2071_v62  ;;  %4058 = vtanh.f32 %v1907_v2  ;;  %vm2007_vm7 = vcmp.eq.s32.totalorder %v1995_v58, %v4830_v45  ;;  %vm2006_vm10 = vcmp.eq.s32.totalorder %v1995_v58, %v4686_v23  ;;  %vm2009_vm11 = vcmp.eq.s32.totalorder %v1996_v18, %v4830_v45 }
 0x3d4   : > { %v4035_v16 = vpop.eup %4034  ;;  %3428 = vmatprep.subr.bf16.mxu1 %v2078_v55  ;;  %4060 = vtanh.f32 %v1904_v57  ;;  %vm3137_vm8 = vmpackc.low %vm2007_vm7, %vm2005_vm6  ;;  %vm2011_vm12 = vcmp.eq.s32.totalorder %v1997_v19, %v4830_v45  ;;  %v1999_v21 = vadd.s32 %v4978_v61, %v4693_v25  ;;  %vm2008_vm15 = vcmp.eq.s32.totalorder %v1996_v18, %v4686_v23  ;;  %v2056_v25 = vld [vmem:[%s4639_s15] sm:$0xff]  ;;  %v2061_v55 = vld [vmem:[%s4639_s15 + $0x28] sm:$0xff] }
 0x3d5   : > { %v4037_v4 = vpop.eup %4036  ;;  %v2070_v6 = vpack.c.bf16 %v4031_v27, %v4035_v16  ;;  %4062 = vtanh.f32 %v1899_v7  ;;  %vm3139_vm13 = vmpackc.low %vm2006_vm10, %vm2004_vm9  ;;  %vm2010_vm0 = vcmp.eq.s32.totalorder %v1997_v19, %v4686_v23  ;;  %vm2013_vm1 = vcmp.eq.s32.totalorder %v1998_v20, %v4830_v45 }
 0x3d6   : > { %v4039_v56 = vpop.eup %4038  ;;  %v2077_v8 = vpack.c.bf16 %v4033_v3, %v4037_v4  ;;  %4064 = vtanh.f32 %v1896_v12  ;;  %vm3141_vm14 = vmpackc.low %vm2011_vm12, %vm2009_vm11  ;;  %vm2015_vm2 = vcmp.eq.s32.totalorder %v1999_v21, %v4830_v45  ;;  %vm2014_vm6 = vcmp.eq.s32.totalorder %v1999_v21, %v4686_v23 }
 0x3d7   : > { %v4041_v46 = vpop.eup %4040  ;;  %3429 = vmatpush3.bf16.msra.mxu1 %v2070_v6  ;;  %vm3143_vm3 = vmpackc.low %vm2010_vm0, %vm2008_vm15  ;;  %v2062_v6 = vld [vmem:[%s4639_s15 + $0x30] sm:$0xff] }
 0x3d8   : > { %v4043_v9 = vpop.eup %4042  ;;  %3430 = vmatprep.subr.bf16.mxu1 %v2077_v8  ;;  %vm3145_vm4 = vmpackc.low %vm2015_vm2, %vm2013_vm1 }
 0x3d9   : > { %v4045_v14 = vpop.eup %4044  ;;  %v2069_v31 = vpack.c.bf16 %v4039_v56, %v4043_v9  ;;  %v2063_v9 = vld [vmem:[%s4639_s15 + $0x38] sm:$0xff] }
 0x3da   : > { %v4047_v15 = vpop.eup %4046  ;;  %v2076_v26 = vpack.c.bf16 %v4041_v46, %v4045_v14 }
 0x3db   : > { %v4049_v34 = vpop.eup %4048  ;;  %3431 = vmatpush3.bf16.msra.mxu1 %v2069_v31 }
 0x3dc   : > { %v4051_v36 = vpop.eup %4050  ;;  %3432 = vmatprep.subr.bf16.mxu1 %v2076_v26 }
 0x3dd   : > { %v4053_v54 = vpop.eup %4052  ;;  %v2068_v37 = vpack.c.bf16 %v4047_v15, %v4051_v36 }
 0x3de   : > { %v2075_v38 = vpack.c.bf16 %v4049_v34, %v4053_v54  ;;  %v4055_v48 = vpop.eup %4054 }
 0x3df   : > { %3433 = vmatpush3.bf16.msra.mxu1 %v2068_v37  ;;  %v4057_v49 = vpop.eup %4056 }
 0x3e0   : > { %3434 = vmatprep.subr.bf16.mxu1 %v2075_v38  ;;  %v2074_v41 = vpack.c.bf16 %v4055_v48, %v4057_v49  ;;  %v4059_v44 = vpop.eup %4058 }
 0x3e1   : > { %v4061_v32 = vpop.eup %4060 }
 0x3e2   : > { %v2073_v51 = vpack.c.bf16 %v4059_v44, %v4061_v32  ;;  %v4063_v52 = vpop.eup %4062 }
 0x3e3   : > { %3435 = vmatpush3.bf16.msra.mxu1 %v2067_v10  ;;  %v4065_v17 = vpop.eup %4064  ;;  %v2059_v10 = vld [vmem:[%s4639_s15 + $0x18] sm:$0xff] }
 0x3e4   : > { %3436 = vmatprep.subr.bf16.mxu1 %v2074_v41  ;;  %v2072_v59 = vpack.c.bf16 %v4063_v52, %v4065_v17 }
 0x3e7   : > { %3437 = vmatpush3.bf16.msra.mxu1 %v2066_v53 }
 0x3e8   : > { %3438 = vmatprep.subr.bf16.mxu1 %v2073_v51 }
 0x3eb   : > { %3439 = vmatpush3.bf16.msra.mxu1 %v2065_v43 }
 0x3ec   : > { %3440 = vmatprep.subr.bf16.mxu1 %v2072_v59 }
 0x3ef   : > { %3441 = vmatpush3.bf16.msra.mxu1 %v2064_v47  ;;  %v2058_v47 = vld [vmem:[%s4639_s15 + $0x10] sm:$0xff] }
 0x3f2   : > { %3136 = vmatmul.mubr.msk.bf16.vlgmr.msra.gmra.mxu1 %vm4989_vm5, %v4407_v5  ;;  %vm2012_vm5 = vcmp.eq.s32.totalorder %v1998_v20, %v4686_v23 }
 0x3f3   : > { %3138 = vmatprep.mubr.msk.bf16.mxu1 %vm3137_vm8, %v4407_v5  ;;  %vm3147_vm7 = vmpackc.low %vm2014_vm6, %vm2012_vm5 }
 0x3fa   : > { %3140 = vmatmul.mubr.msk.bf16.gmra.mxu1 %vm3139_vm13, %v4407_v5 }
 0x3fb   : > { %3142 = vmatprep.mubr.msk.bf16.mxu1 %vm3141_vm14, %v4407_v5 }
 0x402   : > { %3144 = vmatmul.mubr.msk.bf16.gmra.mxu1 %vm3143_vm3, %v4407_v5 }
 0x403   : > { %3146 = vmatprep.mubr.msk.bf16.mxu1 %vm3145_vm4, %v4407_v5 }
 0x40a   : > { %3148 = vmatmul.mubr.msk.bf16.gmra.mxu1 %vm3147_vm7, %v4407_v5 }
 0x4b2   : > { %v3442_v22 = vpop.f32.mrf.mxu1 }
 0x4b4   : > { %v3443_v61 = vpop.f32.mrf.mxu1 }
 0x4b5   : > { %v3444_v45 = vadd.f32 %v3443_v61, %v3442_v22 }
 0x4b6   : > { %v3445_v1 = vpop.f32.mrf.mxu1 }
 0x4b7   : > { %v2145_v28 = vadd.f32 %v3444_v45, %v2056_v25 }
 0x4b8   : > { %v3446_v42 = vpop.f32.mrf.mxu1 }
 0x4b9   : > { %2153 = vst [vmem:[%s4639_s15] sm:$0xff] %v2145_v28  ;;  %v3447_v43 = vadd.f32 %v3446_v42, %v3445_v1 }
 0x4ba   : > { %v3448_v29 = vpop.f32.mrf.mxu1 }
 0x4bb   : > { %v2146_v23 = vadd.f32 %v3447_v43, %v2057_v40 }
 0x4bc   : > { %v3449_v50 = vpop.f32.mrf.mxu1 }
 0x4bd   : > { %2154 = vst [vmem:[%s4639_s15 + $0x8] sm:$0xff] %v2146_v23  ;;  %v3450_v5 = vadd.f32 %v3449_v50, %v3448_v29 }
 0x4be   : > { %v3451_v0 = vpop.f32.mrf.mxu1 }
 0x4bf   : > { %v2147_v24 = vadd.f32 %v3450_v5, %v2058_v47 }
 0x4c0   : > { %v3452_v11 = vpop.f32.mrf.mxu1 }
 0x4c1   : > { %2155 = vst [vmem:[%s4639_s15 + $0x10] sm:$0xff] %v2147_v24  ;;  %v3453_v53 = vadd.f32 %v3452_v11, %v3451_v0 }
 0x4c2   : > { %v3454_v30 = vpop.f32.mrf.mxu1 }
 0x4c3   : > { %v2148_v33 = vadd.f32 %v3453_v53, %v2059_v10 }
 0x4c4   : > { %v3455_v63 = vpop.f32.mrf.mxu1 }
 0x4c5   : > { %2156 = vst [vmem:[%s4639_s15 + $0x18] sm:$0xff] %v2148_v33  ;;  %v3456_v62 = vadd.f32 %v3455_v63, %v3454_v30 }
 0x4c6   : > { %v3457_v27 = vpop.f32.mrf.mxu1 }
 0x4c7   : > { %v2149_v2 = vadd.f32 %v3456_v62, %v2060_v60 }
 0x4c8   : > { %v3458_v3 = vpop.f32.mrf.mxu1 }
 0x4c9   : > { %2157 = vst [vmem:[%s4639_s15 + $0x20] sm:$0xff] %v2149_v2  ;;  %v3459_v16 = vadd.f32 %v3458_v3, %v3457_v27 }
 0x4ca   : > { %v3460_v57 = vpop.f32.mrf.mxu1 }
 0x4cb   : > { %v2150_v4 = vadd.f32 %v3459_v16, %v2061_v55 }
 0x4cc   : > { %v3461_v56 = vpop.f32.mrf.mxu1 }
 0x4cd   : > { %2158 = vst [vmem:[%s4639_s15 + $0x28] sm:$0xff] %v2150_v4  ;;  %v3462_v7 = vadd.f32 %v3461_v56, %v3460_v57 }
 0x4ce   : > { %v3463_v8 = vpop.f32.mrf.mxu1 }
 0x4cf   : > { %v2151_v46 = vadd.f32 %v3462_v7, %v2062_v6 }
 0x4d0   : > { %v3464_v12 = vpop.f32.mrf.mxu1 }
 0x4d1   : > { %2159 = vst [vmem:[%s4639_s15 + $0x30] sm:$0xff] %v2151_v46  ;;  %v3465_v14 = vadd.f32 %v3464_v12, %v3463_v8  ;;  %2164 = sbr.rel (%p3149_p6) target bundleno = 1735 (0x6c7), region = 64 }
 0x4d3   : > { %v2152_v31 = vadd.f32 %v3465_v14, %v2063_v9 }
 0x4d5   : > { %2160 = vst [vmem:[%s4639_s15 + $0x38] sm:$0xff] %v2152_v31 }
 0x4d6   : > { %v4066_v15 = vld [vmem:[#allocation11 + $0xf8] sm:$0xff]   ;;  %v4067_v26 = vld [vmem:[#allocation11 + $0xf0] sm:$0xff]   ;;  %v4068_v34 = vld [vmem:[#allocation11 + $0xe8] sm:$0xff]   ;;  %v2196_v30 = vsub.s32 2, %v4661_v13 }
 0x4d7   : > { %3722 = vmatprep.subr.bf16.mxu0 %v4066_v15  ;;  %v4069_v36 = vld [vmem:[#allocation11 + $0xe0] sm:$0xff]   ;;  %v2165_v54 = vld [vmem:[%s4639_s15] sm:$0xff]  ;;  %v2166_v37 = vld [vmem:[%s4639_s15 + $0x8] sm:$0xff] }
 0x4d8   : > { %3723 = vmatpush3.bf16.msra.mxu0 %v4066_v15  ;;  %v2173_v38 = vpack.c.bf16 %v2166_v37, %v2165_v54  ;;  %v4070_v48 = vld [vmem:[#allocation11 + $0xd8] sm:$0xff]   ;;  %v4071_v49 = vld [vmem:[#allocation11 + $0xd0] sm:$0xff]   ;;  %v4072_v41 = vld [vmem:[#allocation11 + $0xc8] sm:$0xff]   ;;  %v2197_v60 = vrot.slane %v4805_v35, %v2196_v30 }
 0x4d9   : > { %3724 = vmatprep.subr.bf16.mxu0 %v4067_v26  ;;  %v4073_v44 = vld [vmem:[#allocation11 + $0xc0] sm:$0xff]   ;;  %v4086_v32 = vld [vmem:[#allocation11 + $0x138] sm:$0xff]   ;;  %v4087_v51 = vld [vmem:[#allocation11 + $0x130] sm:$0xff]  }
 0x4da   : > { %3738 = vmatprep.mubr.bf16.mxu0 %v2173_v38  ;;  %v2167_v52 = vld [vmem:[%s4639_s15 + $0x10] sm:$0xff]  ;;  %v2168_v17 = vld [vmem:[%s4639_s15 + $0x18] sm:$0xff]  ;;  %3746 = vmatprep.subr.bf16.mxu1 %v4086_v32  ;;  %v2169_v58 = vld [vmem:[%s4639_s15 + $0x20] sm:$0xff] }
 0x4db   : > { %v4074_v39 = vld [vmem:[#allocation11 + $0x178] sm:$0xff]   ;;  %v2170_v59 = vld [vmem:[%s4639_s15 + $0x28] sm:$0xff]  ;;  %3747 = vmatpush3.bf16.msra.mxu1 %v4086_v32  ;;  %v4088_v18 = vld [vmem:[#allocation11 + $0x128] sm:$0xff]   ;;  %v2174_v19 = vpack.c.bf16 %v2168_v17, %v2167_v52  ;;  %v2496_v17 = vsub.s32 4, %v4661_v13 }
 0x4dc   : > { %3725 = vmatpush3.bf16.msra.mxu0 %v4067_v26  ;;  %3748 = vmatprep.subr.bf16.mxu1 %v4087_v51  ;;  %v4075_v20 = vld [vmem:[#allocation11 + $0x170] sm:$0xff]   ;;  %v4089_v21 = vld [vmem:[#allocation11 + $0x120] sm:$0xff]   ;;  %v2175_v22 = vpack.c.bf16 %v2170_v59, %v2169_v58  ;;  %v2171_v25 = vld [vmem:[%s4639_s15 + $0x30] sm:$0xff] }
 0x4dd   : > { %3726 = vmatprep.subr.bf16.mxu0 %v4068_v34  ;;  %v2172_v61 = vld [vmem:[%s4639_s15 + $0x38] sm:$0xff]  ;;  %v4090_v45 = vld [vmem:[#allocation11 + $0x118] sm:$0xff]   ;;  %v4076_v1 = vld [vmem:[#allocation11 + $0x168] sm:$0xff]   ;;  %v2497_v59 = vrot.slane %v4805_v35, %v2496_v17 }
 0x4de   : > { %v2176_v28 = vpack.c.bf16 %v2172_v61, %v2171_v25  ;;  %v4082_v40 = vld [vmem:[%s5127_s9] sm:$0xff]   ;;  %v4077_v42 = vld [vmem:[#allocation11 + $0x160] sm:$0xff]   ;;  %v4079_v29 = vld [vmem:[#allocation11 + $0x150] sm:$0xff]  }
 0x4df   : > { %3749 = vmatpush3.bf16.msra.mxu1 %v4087_v51  ;;  %v4078_v43 = vld [vmem:[#allocation11 + $0x158] sm:$0xff]   ;;  %v4080_v23 = vld [vmem:[#allocation11 + $0x148] sm:$0xff]   ;;  %v4081_v47 = vld [vmem:[#allocation11 + $0x140] sm:$0xff]  }
 0x4e0   : > { %3727 = vmatpush3.bf16.msra.mxu0 %v4068_v34  ;;  %3750 = vmatprep.subr.bf16.mxu1 %v4088_v18  ;;  %v4083_v50 = vld [vmem:[%s5127_s9 + $0x8] sm:$0xff]   ;;  %v4084_v5 = vld [vmem:[%s5127_s9 + $0x10] sm:$0xff]   ;;  %v4085_v0 = vld [vmem:[%s5127_s9 + $0x18] sm:$0xff]  }
 0x4e1   : > { %3728 = vmatprep.subr.bf16.mxu0 %v4069_v36  ;;  %v4091_v24 = vld [vmem:[#allocation11 + $0x110] sm:$0xff]   ;;  %v4092_v10 = vld [vmem:[#allocation11 + $0x108] sm:$0xff]   ;;  %v4093_v11 = vld [vmem:[#allocation11 + $0x100] sm:$0xff]  }
 0x4e2   : > { %v4094_v53 = vld [vmem:[#allocation11 + $0x1b8] sm:$0xff]   ;;  %v4095_v15 = vld [vmem:[#allocation11 + $0x1b0] sm:$0xff]   ;;  %v4097_v32 = vld [vmem:[#allocation11 + $0x1a0] sm:$0xff]  }
 0x4e3   : > { %3751 = vmatpush3.bf16.msra.mxu1 %v4088_v18  ;;  %v4098_v51 = vld [vmem:[#allocation11 + $0x198] sm:$0xff]   ;;  %v4099_v52 = vld [vmem:[#allocation11 + $0x190] sm:$0xff]   ;;  %v4100_v58 = vld [vmem:[#allocation11 + $0x188] sm:$0xff]  }
 0x4e4   : > { %3729 = vmatpush3.bf16.msra.mxu0 %v4069_v36  ;;  %3752 = vmatprep.subr.bf16.mxu1 %v4089_v21 }
 0x4e5   : > { %3730 = vmatprep.subr.bf16.mxu0 %v4070_v48 }
 0x4e7   : > { %3753 = vmatpush3.bf16.msra.mxu1 %v4089_v21 }
 0x4e8   : > { %3731 = vmatpush3.bf16.msra.mxu0 %v4070_v48  ;;  %3754 = vmatprep.subr.bf16.mxu1 %v4090_v45  ;;  %v4096_v48 = vld [vmem:[#allocation11 + $0x1a8] sm:$0xff]  }
 0x4e9   : > { %3732 = vmatprep.subr.bf16.mxu0 %v4071_v49 }
 0x4eb   : > { %3755 = vmatpush3.bf16.msra.mxu1 %v4090_v45 }
 0x4ec   : > { %3733 = vmatpush3.bf16.msra.mxu0 %v4071_v49  ;;  %3756 = vmatprep.subr.bf16.mxu1 %v4091_v24 }
 0x4ed   : > { %3734 = vmatprep.subr.bf16.mxu0 %v4072_v41 }
 0x4ef   : > { %3757 = vmatpush3.bf16.msra.mxu1 %v4091_v24 }
 0x4f0   : > { %3735 = vmatpush3.bf16.msra.mxu0 %v4072_v41  ;;  %3758 = vmatprep.subr.bf16.mxu1 %v4092_v10 }
 0x4f1   : > { %3736 = vmatprep.subr.bf16.mxu0 %v4073_v44 }
 0x4f3   : > { %3759 = vmatpush3.bf16.msra.mxu1 %v4092_v10 }
 0x4f4   : > { %3737 = vmatpush3.bf16.msra.mxu0 %v4073_v44  ;;  %3760 = vmatprep.subr.bf16.mxu1 %v4093_v11 }
 0x4f5   : > { %3770 = vmatprep.subr.bf16.mxu0 %v4074_v39 }
 0x4f7   : > { %3739 = vmatmul.mubr.bf16.vlgmr.msra.gmra.mxu0 %v2174_v19  ;;  %3761 = vmatpush3.bf16.msra.mxu1 %v4093_v11 }
 0x4f8   : > { %3771 = vmatpush3.bf16.msra.mxu0 %v4074_v39  ;;  %3742 = vmatprep.mubr.bf16.mxu0 %v2175_v22 }
 0x4f9   : > { %3772 = vmatprep.subr.bf16.mxu0 %v4075_v20  ;;  %3794 = vmatprep.subr.bf16.mxu1 %v4094_v53 }
 0x4fc   : > { %3773 = vmatpush3.bf16.msra.mxu0 %v4075_v20  ;;  %v4101_v20 = vld [vmem:[#allocation11 + $0x180] sm:$0xff]  }
 0x4fd   : > { %3774 = vmatprep.subr.bf16.mxu0 %v4076_v1 }
 0x4ff   : > { %3743 = vmatmul.mubr.bf16.gmra.mxu0 %v2176_v28 }
 0x500   : > { %3775 = vmatpush3.bf16.msra.mxu0 %v4076_v1  ;;  %3786 = vmatprep.mubr.bf16.mxu0 %v4082_v40 }
 0x501   : > { %3776 = vmatprep.subr.bf16.mxu0 %v4077_v42 }
 0x504   : > { %3777 = vmatpush3.bf16.msra.mxu0 %v4077_v42 }
 0x505   : > { %3778 = vmatprep.subr.bf16.mxu0 %v4078_v43 }
 0x508   : > { %3779 = vmatpush3.bf16.msra.mxu0 %v4078_v43 }
 0x509   : > { %3780 = vmatprep.subr.bf16.mxu0 %v4079_v29 }
 0x50c   : > { %3781 = vmatpush3.bf16.msra.mxu0 %v4079_v29 }
 0x50d   : > { %3782 = vmatprep.subr.bf16.mxu0 %v4080_v23 }
 0x510   : > { %3783 = vmatpush3.bf16.msra.mxu0 %v4080_v23 }
 0x511   : > { %3784 = vmatprep.subr.bf16.mxu0 %v4081_v47 }
 0x514   : > { %3785 = vmatpush3.bf16.msra.mxu0 %v4081_v47 }
 0x517   : > { %3787 = vmatmul.mubr.bf16.vlgmr.msra.gmra.mxu0 %v4083_v50 }
 0x518   : > { %3790 = vmatprep.mubr.bf16.mxu0 %v4084_v5 }
 0x51f   : > { %3791 = vmatmul.mubr.bf16.gmra.mxu0 %v4085_v0 }
 0x5b7   : > { %v3740_v33 = vpop.f32.mrf.mxu0 }
 0x5b8   : > { %v2289_v55 = vadd.f32 %v3740_v33, %v2197_v60 }
 0x5b9   : > { %v2280_v63 = vpop.f32.mrf.mxu0 }
 0x5ba   : > { %v2281_v27 = vadd.f32 %v2280_v63, %v2197_v60  ;;  %v2313_v7 = vmax.f32 %v2289_v55, 0.0 }
 0x5bb   : > { %v3741_v62 = vpop.f32.mrf.mxu0 }
 0x5bc   : > { %v2292_v2 = vadd.f32 %v3741_v62, %v2197_v60  ;;  %v2311_v6 = vmax.f32 %v2281_v27, 0.0 }
 0x5bd   : > { %v2283_v3 = vpop.f32.mrf.mxu0 }
 0x5be   : > { %v2284_v16 = vadd.f32 %v2283_v3, %v2197_v60  ;;  %v2314_v57 = vmax.f32 %v2292_v2, 0.0 }
 0x5bf   : > { %v3744_v4 = vpop.f32.mrf.mxu0 }
 0x5c0   : > { %v2312_v56 = vmax.f32 %v2284_v16, 0.0  ;;  %v2305_v8 = vadd.f32 %v3744_v4, %v2197_v60  ;;  %v2320_v14 = vpack.c.bf16 %v2314_v57, %v2313_v7  ;;  %v2342_v57 = vsub.s32 3, %v4661_v13 }
 0x5c1   : > { %v2296_v46 = vpop.f32.mrf.mxu0 }
 0x5c2   : > { %v2297_v9 = vadd.f32 %v2296_v46, %v2197_v60  ;;  %v2319_v12 = vpack.c.bf16 %v2312_v56, %v2311_v6  ;;  %v2317_v34 = vmax.f32 %v2305_v8, 0.0  ;;  %v2666_v6 = vsub.s32 5, %v4661_v13 }
 0x5c3   : > { %v3745_v31 = vpop.f32.mrf.mxu0  ;;  %v2343_v56 = vrot.slane %v4805_v35, %v2342_v57 }
 0x5c4   : > { %3762 = vmatprep.mubr.bf16.mxu1 %v2319_v12  ;;  %v2308_v26 = vadd.f32 %v3745_v31, %v2197_v60  ;;  %v2315_v54 = vmax.f32 %v2297_v9, 0.0  ;;  %v2667_v8 = vrot.slane %v4805_v35, %v2666_v6 }
 0x5c5   : > { %3763 = vmatmul.mubr.bf16.vlgmr.msra.gmra.mxu1 %v2320_v14  ;;  %v2299_v36 = vpop.f32.mrf.mxu0 }
 0x5c6   : > { %v2318_v37 = vmax.f32 %v2308_v26, 0.0  ;;  %3795 = vmatpush3.bf16.msra.mxu1 %v4094_v53  ;;  %v2300_v38 = vadd.f32 %v2299_v36, %v2197_v60 }
 0x5c7   : > { %3796 = vmatprep.subr.bf16.mxu1 %v4095_v15 }
 0x5c8   : > { %v2316_v49 = vmax.f32 %v2300_v38, 0.0  ;;  %v2322_v41 = vpack.c.bf16 %v2318_v37, %v2317_v34 }
 0x5ca   : > { %v2321_v44 = vpack.c.bf16 %v2316_v49, %v2315_v54  ;;  %3797 = vmatpush3.bf16.msra.mxu1 %v4095_v15 }
 0x5cb   : > { %3798 = vmatprep.subr.bf16.mxu1 %v4096_v48 }
 0x5cc   : > { %3766 = vmatprep.mubr.bf16.mxu1 %v2321_v44 }
 0x5cd   : > { %3767 = vmatmul.mubr.bf16.gmra.mxu1 %v2322_v41 }
 0x5ce   : > { %3799 = vmatpush3.bf16.msra.mxu1 %v4096_v48 }
 0x5cf   : > { %3800 = vmatprep.subr.bf16.mxu1 %v4097_v32 }
 0x5d2   : > { %3801 = vmatpush3.bf16.msra.mxu1 %v4097_v32 }
 0x5d3   : > { %3802 = vmatprep.subr.bf16.mxu1 %v4098_v51 }
 0x5d6   : > { %3803 = vmatpush3.bf16.msra.mxu1 %v4098_v51 }
 0x5d7   : > { %v3788_v39 = vpop.f32.mrf.mxu0  ;;  %3804 = vmatprep.subr.bf16.mxu1 %v4099_v52 }
 0x5d8   : > { %v2613_v25 = vadd.f32 %v3788_v39, %v2497_v59 }
 0x5d9   : > { %v2604_v18 = vpop.f32.mrf.mxu0 }
 0x5da   : > { %3805 = vmatpush3.bf16.msra.mxu1 %v4099_v52  ;;  %v2605_v21 = vadd.f32 %v2604_v18, %v2497_v59  ;;  %v2637_v43 = vmax.f32 %v2613_v25, 0.0 }
 0x5db   : > { %v3789_v19 = vpop.f32.mrf.mxu0  ;;  %3806 = vmatprep.subr.bf16.mxu1 %v4100_v58 }
 0x5dc   : > { %v2616_v22 = vadd.f32 %v3789_v19, %v2497_v59  ;;  %v2635_v40 = vmax.f32 %v2605_v21, 0.0 }
 0x5dd   : > { %v2607_v61 = vpop.f32.mrf.mxu0 }
 0x5de   : > { %v2608_v45 = vadd.f32 %v2607_v61, %v2497_v59  ;;  %3807 = vmatpush3.bf16.msra.mxu1 %v4100_v58  ;;  %v2638_v1 = vmax.f32 %v2616_v22, 0.0 }
 0x5df   : > { %v3792_v28 = vpop.f32.mrf.mxu0  ;;  %3808 = vmatprep.subr.bf16.mxu1 %v4101_v20 }
 0x5e0   : > { %v2636_v42 = vmax.f32 %v2608_v45, 0.0  ;;  %v2644_v47 = vpack.c.bf16 %v2638_v1, %v2637_v43  ;;  %v2629_v24 = vadd.f32 %v3792_v28, %v2497_v59 }
 0x5e1   : > { %v2620_v29 = vpop.f32.mrf.mxu0 }
 0x5e2   : > { %v2643_v23 = vpack.c.bf16 %v2636_v42, %v2635_v40  ;;  %3809 = vmatpush3.bf16.msra.mxu1 %v4101_v20  ;;  %v2621_v5 = vadd.f32 %v2620_v29, %v2497_v59  ;;  %v2641_v60 = vmax.f32 %v2629_v24, 0.0 }
 0x5e3   : > { %v3793_v50 = vpop.f32.mrf.mxu0 }
 0x5e4   : > { %v2632_v0 = vadd.f32 %v3793_v50, %v2497_v59  ;;  %3810 = vmatprep.mubr.bf16.mxu1 %v2643_v23  ;;  %v2639_v30 = vmax.f32 %v2621_v5, 0.0 }
 0x5e5   : > { %v2623_v10 = vpop.f32.mrf.mxu0  ;;  %3811 = vmatmul.mubr.bf16.vlgmr.msra.gmra.mxu1 %v2644_v47 }
 0x5e6   : > { %v2624_v11 = vadd.f32 %v2623_v10, %v2497_v59  ;;  %v2642_v53 = vmax.f32 %v2632_v0, 0.0 }
 0x5e8   : > { %v2640_v33 = vmax.f32 %v2624_v11, 0.0  ;;  %v2646_v62 = vpack.c.bf16 %v2642_v53, %v2641_v60 }
 0x5ea   : > { %v2645_v63 = vpack.c.bf16 %v2640_v33, %v2639_v30 }
 0x5ec   : > { %3814 = vmatprep.mubr.bf16.mxu1 %v2645_v63 }
 0x5ed   : > { %3815 = vmatmul.mubr.bf16.gmra.mxu1 %v2646_v62 }
 0x685   : > { %v3764_v27 = vpop.f32.mrf.mxu1 }
 0x686   : > { %v2435_v46 = vadd.f32 %v3764_v27, %v2343_v56 }
 0x687   : > { %v2426_v2 = vpop.f32.mrf.mxu1 }
 0x688   : > { %v2427_v12 = vadd.f32 %v2426_v2, %v2343_v56  ;;  %4102 = vtanh.f32 %v2435_v46 }
 0x689   : > { %v3765_v55 = vpop.f32.mrf.mxu1 }
 0x68a   : > { %v2438_v15 = vadd.f32 %v3765_v55, %v2343_v56 }
 0x68b   : > { %v2429_v3 = vpop.f32.mrf.mxu1 }
 0x68c   : > { %v2430_v36 = vadd.f32 %v2429_v3, %v2343_v56 }
 0x68d   : > { %v3768_v16 = vpop.f32.mrf.mxu1 }
 0x68e   : > { %v2451_v37 = vadd.f32 %v3768_v16, %v2343_v56 }
 0x68f   : > { %v2442_v4 = vpop.f32.mrf.mxu1 }
 0x690   : > { %v2443_v48 = vadd.f32 %v2442_v4, %v2343_v56 }
 0x691   : > { %v3769_v7 = vpop.f32.mrf.mxu1 }
 0x692   : > { %v2454_v44 = vadd.f32 %v3769_v7, %v2343_v56 }
 0x693   : > { %v2445_v9 = vpop.f32.mrf.mxu1 }
 0x694   : > { %v2446_v52 = vadd.f32 %v2445_v9, %v2343_v56 }
 0x695   : > { %v4103_v59 = vpop.eup %4102 }
 0x6a5   : > { %v3812_v14 = vpop.f32.mrf.mxu1 }
 0x6a6   : > { %v2759_v31 = vadd.f32 %v3812_v14, %v2667_v8 }
 0x6a7   : > { %v2750_v26 = vpop.f32.mrf.mxu1 }
 0x6a8   : > { %4104 = vtanh.f32 %v2759_v31  ;;  %v2751_v34 = vadd.f32 %v2750_v26, %v2667_v8 }
 0x6a9   : > { %4106 = vtanh.f32 %v2427_v12  ;;  %v3813_v54 = vpop.f32.mrf.mxu1 }
 0x6aa   : > { %4108 = vtanh.f32 %v2751_v34  ;;  %v2762_v13 = vadd.f32 %v3813_v54, %v2667_v8 }
 0x6ab   : > { %4110 = vtanh.f32 %v2438_v15  ;;  %v2753_v38 = vpop.f32.mrf.mxu1 }
 0x6ac   : > { %4112 = vtanh.f32 %v2762_v13  ;;  %v2754_v35 = vadd.f32 %v2753_v38, %v2667_v8 }
 0x6ad   : > { %4114 = vtanh.f32 %v2430_v36  ;;  %v3816_v49 = vpop.f32.mrf.mxu1 }
 0x6ae   : > { %4116 = vtanh.f32 %v2754_v35  ;;  %v2775_v41 = vadd.f32 %v3816_v49, %v2667_v8 }
 0x6af   : > { %4118 = vtanh.f32 %v2451_v37  ;;  %v2766_v32 = vpop.f32.mrf.mxu1 }
 0x6b0   : > { %4120 = vtanh.f32 %v2775_v41  ;;  %v2767_v51 = vadd.f32 %v2766_v32, %v2667_v8 }
 0x6b1   : > { %4122 = vtanh.f32 %v2443_v48  ;;  %v3817_v17 = vpop.f32.mrf.mxu1 }
 0x6b2   : > { %4124 = vtanh.f32 %v2767_v51  ;;  %v2778_v39 = vadd.f32 %v3817_v17, %v2667_v8 }
 0x6b3   : > { %4126 = vtanh.f32 %v2454_v44  ;;  %v2769_v58 = vpop.f32.mrf.mxu1 }
 0x6b4   : > { %4128 = vtanh.f32 %v2778_v39  ;;  %v2770_v18 = vadd.f32 %v2769_v58, %v2667_v8 }
 0x6b5   : > { %v4105_v19 = vpop.eup %4104  ;;  %4130 = vtanh.f32 %v2446_v52 }
 0x6b6   : > { %v4107_v20 = vpop.eup %4106  ;;  %v2791_v21 = vadd.f32 %v4105_v19, %v4103_v59  ;;  %4132 = vtanh.f32 %v2770_v18 }
 0x6b7   : > { %v4109_v22 = vpop.eup %4108 }
 0x6b8   : > { %v4111_v25 = vpop.eup %4110  ;;  %2799 = vst [vmem:[%s4639_s15 + $0x10] sm:$0xff] %v2791_v21  ;;  %v2789_v61 = vadd.f32 %v4109_v22, %v4107_v20 }
 0x6b9   : > { %v4113_v45 = vpop.eup %4112 }
 0x6ba   : > { %v4115_v1 = vpop.eup %4114  ;;  %2797 = vst [vmem:[%s4639_s15] sm:$0xff] %v2789_v61  ;;  %v2792_v28 = vadd.f32 %v4113_v45, %v4111_v25 }
 0x6bb   : > { %v4117_v40 = vpop.eup %4116 }
 0x6bc   : > { %v4119_v42 = vpop.eup %4118  ;;  %2800 = vst [vmem:[%s4639_s15 + $0x18] sm:$0xff] %v2792_v28  ;;  %v2790_v43 = vadd.f32 %v4117_v40, %v4115_v1 }
 0x6bd   : > { %v4121_v29 = vpop.eup %4120 }
 0x6be   : > { %v4123_v23 = vpop.eup %4122  ;;  %2798 = vst [vmem:[%s4639_s15 + $0x8] sm:$0xff] %v2790_v43  ;;  %v2795_v47 = vadd.f32 %v4121_v29, %v4119_v42 }
 0x6bf   : > { %v4125_v50 = vpop.eup %4124 }
 0x6c0   : > { %v4127_v5 = vpop.eup %4126  ;;  %2803 = vst [vmem:[%s4639_s15 + $0x30] sm:$0xff] %v2795_v47  ;;  %v2793_v0 = vadd.f32 %v4125_v50, %v4123_v23 }
 0x6c1   : > { %v4129_v24 = vpop.eup %4128 }
 0x6c2   : > { %v4131_v10 = vpop.eup %4130  ;;  %2801 = vst [vmem:[%s4639_s15 + $0x20] sm:$0xff] %v2793_v0  ;;  %v2796_v11 = vadd.f32 %v4129_v24, %v4127_v5 }
 0x6c3   : > { %v4133_v53 = vpop.eup %4132 }
 0x6c4   : > { %2804 = vst [vmem:[%s4639_s15 + $0x38] sm:$0xff] %v2796_v11  ;;  %v2794_v30 = vadd.f32 %v4133_v53, %v4131_v10 }
 0x6c6   : > { %2802 = vst [vmem:[%s4639_s15 + $0x28] sm:$0xff] %v2794_v30 }
 0x6c7 PF: > { %s5267_s5 = sld [smem:[#allocation27_spill]]  ;;  %s3227_s18 = sshll.u32 %s4384_s25, 10 }
 0x6c8   : > { %s5268_s8 = sld [smem:[#allocation33_spill]]  ;;  %s2819_s10 = sshll.u32 %s4639_s15, 4  ;;  %s5162_s10 = int_to_ptr.vmem [resolvable:$true] %s2819_s10 }
 0x6c9   : > { %s5166_s6 = scalar_lea.sflag [#allocation8], %s289_s3  ;;  %s4262_s7 = scalar_lea.vmem %s5162_s10, 1024 }
 0x6ca   : > { %p4263_p5 = scmp.ne.s32.totalorder %s5162_s10, %s4262_s7  ;;  %s4408_s25 = smov [#allocation14]  }
 0x6cb   : > { %s4266_s16 = sshll.u32 %s4408_s25, 4  ;;  %s4267_s16 = int_to_ptr.vmem [resolvable:$false] %s4266_s16 }
 0x6cc   : > { %s4268_s13 = scalar_lea.vmem %s4267_s16, 2048  ;;  %p4269_p2 = scmp.lt.s32.totalorder %s5162_s10, %s4267_s16 }
 0x6cd   : > { %p5269_p1 = scmp.ne.s32.totalorder %s5267_s5, 0  ;;  %p4270_p4 = scmp.lt.s32.totalorder %s4268_s13, %s4262_s7 }
 0x6ce   : > { %s5159_s14 = scalar_lea.hbm %s5268_s8, %s3227_s18 }
 0x6cf   : > { %p4264_p7 = pnand %p4263_p5, %p5269_p1  ;;  %p4271_p9 = por %p4270_p4, %p4269_p2 }
 0x6d1   : > { %p4265_p11 = pneg %p4264_p7 }
 0x6d3   : > { %p4272_p3 = pnand %p4271_p9, %p4265_p11 }
 0x6d5   : > { %4275 = shalt.err (!%p4272_p3)
}
 0x6d6   : > { %s4276_s3 = scalar_lea.hbm %s5159_s14, 1024  ;;  %s4280_s11 = scalar_lea.hbm %s5268_s8, 2048 }
 0x6d7   : > { %p4277_p0 = scmp.ne.s32.totalorder %s5159_s14, %s4276_s3  ;;  %p4281_p10 = scmp.lt.s32.totalorder %s5159_s14, %s5268_s8 }
 0x6d8   : > { %p4282_p12 = scmp.lt.s32.totalorder %s4280_s11, %s4276_s3 }
 0x6d9   : > { %p4278_p13 = pnand %p4277_p0, %p5269_p1 }
 0x6da   : > { %p4283_p6 = por %p4282_p12, %p4281_p10 }
 0x6db   : > { %p4279_p8 = pneg %p4278_p13 }
 0x6dd   : > { %p4284_p5 = pnand %p4283_p6, %p4279_p8 }
 0x6df   : > { %4287 = shalt.err (!%p4284_p5)
}
 0x6e0   : > { %s4409_s21 = smov 128   ;;  %s4410_s9 = smov 8  }
 0x6e1   : > { %3830 = dma.vmem_to_hbm [thread:$0]  (%p5269_p1), %s5162_s10, 1024, %s5159_s14, %s5166_s6, %s4409_s21, %s4409_s21, %s4410_s9  }
 0x6e2 PF: > { %s5270_s18 = sld [smem:[#allocation25_spill]]  ;;  %p3855_p7 = scmp.ge.s32.totalorder %s4396_s28, 2 }
 0x6e3   : > { %s5271_s27 = sld [smem:[#allocation28_spill]] }
 0x6e8   : > { %s2834_s17 = sand.u32 1, %s5270_s18  }
 0x6e9   : > { %p5272_p11 = scmp.ne.s32.totalorder %s5271_s27, 0  ;;  %s2835_s7 = scalar_lea.sflag [#allocation8], %s2834_s17 }
 0x6eb   : > { %p3847_p2 = pnand %p3855_p7, %p5272_p11 }
 0x6ed   : > { %p3848_p4 = pneg %p3847_p2 }
 0x6ef   : > { %4351 = dma.done.wait (%p3848_p4), %s2835_s7, 1024  }
 0x6f0   : > { %4353 = vsyncadd (%p3848_p4), %s2835_s7, 4294966272  ;;  %s25_s28 = sadd.s32 1, %s4396_s28   ;;  %s5273_s25 = sld [smem:[#allocation26_spill]] }
 0x6f1   : > { %p22_p9 = scmp.ge.s32.totalorder %s25_s28, 6   ;;  %s5274_s5 = sld [smem:[#allocation29_spill]] }
 0x6f2   : > { %s5275_s27 = sld [smem:[#allocation30_spill]]  ;;  %s5276_s18 = smov %s4360_s19 }
 0x6f3   : > { %s5277_s19 = smov %s4364_s20  ;;  %s5278_s20 = smov %s4580_s4 }
 0x6f4   : > { %s5279_s21 = smov %s4372_s22  ;;  %s5280_s22 = smov %s4376_s23 }
 0x6f5   : > { %s5281_s23 = smov %s4572_s30  ;;  %s5282_s24 = smov %s4388_s26 }
 0x6f6   :  { %24 = sbr.rel (!%p22_p9) target bundleno = 16 (0x10), region = 121 }
 0x6f7   : > { %s5283_s26 = smov %s5274_s5 }
 0x6fb   :  { %2840 = vsyncpa [#allocation7], 1 }
 0x6fc   :  { %2842 = vsyncpa [#allocation7 + $0x1], 1 }
 0x6fd   :  { %2843 = vsyncpa [#allocation10], 1 }
 0x6fe   :  { %2845 = vsyncpa [#allocation10 + $0x1], 1 }
 0x6ff   :  { %2846 = vsyncpa [#allocation13], 1 }
 0x700   :  { %2847 = vsyncpa [#allocation8], 1 }
 0x701   :  { %2849 = vsyncpa [#allocation8 + $0x1], 1 }
 0x702   :  { %2850 = vsyncmov [#allocation5] }
 0x705   :  { %s2851_s4 = vpop.sfrf %2850 }
 0x706   :  { %p3192_p1 = scmp.ne.s32.totalorder %s2851_s4, 0 }
 0x708   :  { %2855 = shalt.err (%p3192_p1)  }

</bundles_post_ra>
